<compile_context>
chip_gen: v5e
topology: v5e:2x2
jax: 0.10.0
libtpu: 0.0.40
codegen_flags: <defaults>
</compile_context>

<pallas_src>
import math
import functools

import jax
import jax.numpy as jnp
from jax.experimental import pallas as pl
from jax.experimental.pallas import tpu as pltpu


def _layer_norm(x, g, b, eps):
    mu = jnp.mean(x, axis=-1, keepdims=True)
    var = jnp.mean(jnp.square(x - mu), axis=-1, keepdims=True)  # biased, as torch LN
    return (x - mu) * jax.lax.rsqrt(var + eps) * g + b


def _gelu_tanh(x):
    # TODO(synk): ACT2FN["gelu"] is the exact erf GELU; tanh approximation used
    # here (max abs deviation ~1e-3) since erf has no guaranteed Mosaic lowering.
    c = math.sqrt(2.0 / math.pi)
    return 0.5 * x * (1.0 + jnp.tanh(c * (x + 0.044715 * (x * x * x))))


def bert_layer_kernel(
    x_ref,          # (1, S, H)  full sequence for this batch element (f32)
    mask_ref,       # (1, 1, S)  additive attention mask
    wq_ref, bq_ref,      # (H, H), (1, H)    -- 1/sqrt(d) pre-folded
    wkv_ref, bkv_ref,    # (H, 2H), (1, 2H)  -- fused K|V, split at column H
    wo_ref, bo_ref,      # (H, H), (1, H)
    ln1g_ref, ln1b_ref,  # (1, H), (1, H)
    wi_ref, bi_ref,      # (H, I), (1, I)
    wo2_ref, bo2_ref,    # (I, H), (1, H)
    ln2g_ref, ln2b_ref,  # (1, H), (1, H)
    o_ref,          # (1, TQ, H)
    k_scr,          # VMEM (nH, S, d) compute dtype -- cached across q tiles
    v_scr,          # VMEM (nH, S, d) compute dtype
    *,
    num_heads: int,
    head_dim: int,
    ln_eps: float,
    compute_dtype,
):
    f32 = jnp.float32
    cd = compute_dtype
    nH, d = num_heads, head_dim
    S, H = x_ref.shape[1], x_ref.shape[2]
    TQ = o_ref.shape[1]
    q_idx = pl.program_id(1)

    # ---- K/V projection: once per batch element, cached head-major in VMEM ----
    @pl.when(q_idx == 0)
    def _():
        x_kv = x_ref[0].astype(cd)                                   # (S, H)
        kv = (jnp.dot(x_kv, wkv_ref[...], preferred_element_type=f32)
              + bkv_ref[...]).astype(k_scr.dtype)                    # (S, 2H)
        # Split at lane column H (128-aligned whenever H is), then head-major.
        k_scr[...] = pltpu.einshape("shd->hsd", kv[:, :H].reshape(S, nH, d))
        v_scr[...] = pltpu.einshape("shd->hsd", kv[:, H:].reshape(S, nH, d))

    # ---- Query tile sliced from the resident full-sequence block ----
    q_start = pl.multiple_of(q_idx * TQ, TQ)
    x_q = x_ref[0, pl.ds(q_start, TQ), :]                            # (TQ, H) f32
    mask = mask_ref[0]                                               # (1, S)

    # Q projection: lane-dense (TQ,H)@(H,H); scale folded into the weights.
    q2d = (jnp.dot(x_q.astype(cd), wq_ref[...], preferred_element_type=f32)
           + bq_ref[...]).astype(cd)                                 # (TQ, H)
    qh = pltpu.einshape("qhd->hqd", q2d.reshape(TQ, nH, d))          # (nH, TQ, d)

    kh = k_scr[...]                                                  # (nH, S, d)
    vh = v_scr[...]                                                  # (nH, S, d)

    # Attention scores + additive mask, online-style softmax (max-subtracted).
    scores = jnp.einsum("hqd,hkd->hqk", qh, kh,
                        preferred_element_type=f32)                  # (nH, TQ, S)
    scores = scores + mask[None]                                     # (1,1,S) bcast

    m = jnp.max(scores, axis=-1, keepdims=True)
    p = jnp.exp(scores - m)
    denom = jnp.sum(p, axis=-1, keepdims=True)                       # (nH, TQ, 1)

    # Normalize AFTER the PV matmul: (nH,TQ,d) scale instead of (nH,TQ,S).
    ctx = jnp.einsum("hqk,hkd->hqd", p.astype(cd), vh,
                     preferred_element_type=f32)                     # (nH, TQ, d)
    ctx = (ctx * pl.reciprocal(denom, approx=True)).astype(cd)       # EUP, not VALU

    # Merge heads back into the lane dim; output projection as ONE K=H matmul.
    ctx2d = pltpu.einshape("hqd->qhd", ctx).reshape(TQ, H)           # (TQ, H)
    attn = (jnp.dot(ctx2d, wo_ref[...], preferred_element_type=f32)
            + bo_ref[...])                                           # (TQ, H)

    # Residual + LayerNorm (post-norm).
    a = _layer_norm(attn + x_q, ln1g_ref[...], ln1b_ref[...], ln_eps)

    # Feed-forward: GELU(Wi a + bi) Wo2 + bo2, residual, LayerNorm.
    inter = jnp.dot(a.astype(cd), wi_ref[...],
                    preferred_element_type=f32) + bi_ref[...]
    inter = _gelu_tanh(inter)
    ffn = jnp.dot(inter.astype(cd), wo2_ref[...],
                  preferred_element_type=f32) + bo2_ref[...]

    y = _layer_norm(ffn + a, ln2g_ref[...], ln2b_ref[...], ln_eps)
    o_ref[0] = y.astype(o_ref.dtype)


def prepare_params(params, *, num_heads, compute_dtype=jnp.bfloat16):
    """One-time, host-side weight preparation (hoisted out of the forward path).

    Folds 1/sqrt(d) into Wq/bq, fuses K|V weights, and pre-casts all matmul
    operands to the compute dtype (bf16 by default -> half the weight DMA/VMEM).
    Biases and LayerNorm params stay f32 (added/applied after f32 accumulation).
    """
    H = params["wq"].shape[0]
    assert H % num_heads == 0
    d = H // num_heads
    gamma = math.sqrt(d)
    cd = compute_dtype
    wkv = jnp.concatenate([params["wk"], params["wv"]], axis=1)      # (H, 2H)
    bkv = jnp.concatenate([params["bk"], params["bv"]], axis=1)      # (1, 2H)
    return {
        "num_heads": num_heads,
        "compute_dtype": cd,
        "wq": (params["wq"] / gamma).astype(cd), "bq": params["bq"] / gamma,
        "wkv": wkv.astype(cd), "bkv": bkv,
        "wo": params["wo"].astype(cd), "bo": params["bo"],
        "ln1_g": params["ln1_g"], "ln1_b": params["ln1_b"],
        "wi": params["wi"].astype(cd), "bi": params["bi"],
        "wo2": params["wo2"].astype(cd), "bo2": params["bo2"],
        "ln2_g": params["ln2_g"], "ln2_b": params["ln2_b"],
    }


def bert_layer(x, attention_mask, prepared, *, q_tile=128, ln_eps=1e-12,
               vmem_limit_bytes=64 * 1024 * 1024):
    """x: (B, S, H) f32; attention_mask: (B, S) additive f32.

    q_tile: sweep to 256 on v6e (128 MiB VMEM); keep <=128 on v5e/v7x.
    vmem_limit_bytes: raise above the default scoped limit so the chosen block
    sizes are actually usable (<= ~48 MiB recommended on v7x, ~96 MiB on v6e).
    """
    B, S, H = x.shape
    nH = prepared["num_heads"]
    cd = prepared["compute_dtype"]
    assert H % nH == 0
    d = H // nH
    I = prepared["wi"].shape[1]
    # TODO(synk): when S % q_tile != 0 we fall back to a single (nH,S,S) score
    # block; fine for short S but a VMEM hazard for long unaligned S (esp. v7x).
    TQ = q_tile if (S % q_tile == 0) else S
    n_q = S // TQ
    # Note: B * n_q >= 2 is needed to keep both v7x TensorCores busy.

    mask3 = attention_mask.reshape(B, 1, S).astype(jnp.float32)

    kern = functools.partial(
        bert_layer_kernel,
        num_heads=nH, head_dim=d, ln_eps=ln_eps, compute_dtype=cd,
    )
    cmap = lambda b, q: (0, 0)

    def run(single_buffer_weights):
        # Constant (grid-invariant) weight inputs: single-buffer to halve their
        # VMEM residency; they are never re-fetched so no pipelining is lost.
        wkw = {"pipeline_mode": pl.Buffered(1)} if single_buffer_weights else {}
        wspec = lambda shape: pl.BlockSpec(shape, cmap, **wkw)

        grid_spec = pltpu.PrefetchScalarGridSpec(
            num_scalar_prefetch=0,
            grid=(B, n_q),
            in_specs=[
                pl.BlockSpec((1, S, H), lambda b, q: (b, 0, 0)),   # x (full seq, q-invariant)
                pl.BlockSpec((1, 1, S), lambda b, q: (b, 0, 0)),   # additive mask
                wspec((H, H)), wspec((1, H)),                      # Wq (scaled), bq
                wspec((H, 2 * H)), wspec((1, 2 * H)),              # Wkv (fused), bkv
                wspec((H, H)), wspec((1, H)),                      # Wo, bo
                wspec((1, H)), wspec((1, H)),                      # LN1 gamma, beta
                wspec((H, I)), wspec((1, I)),                      # Wi, bi
                wspec((I, H)), wspec((1, H)),                      # Wo2, bo2
                wspec((1, H)), wspec((1, H)),                      # LN2 gamma, beta
            ],
            out_specs=pl.BlockSpec((1, TQ, H), lambda b, q: (b, q, 0)),
            scratch_shapes=[
                pltpu.VMEM((nH, S, d), cd),   # cached K (head-major)
                pltpu.VMEM((nH, S, d), cd),   # cached V (head-major)
            ],
        )
        return pl.pallas_call(
            kern,
            out_shape=jax.ShapeDtypeStruct((B, S, H), x.dtype),
            grid_spec=grid_spec,
            compiler_params=pltpu.CompilerParams(
                # q axis carries the K/V scratch -> "arbitrary"; batch axis is
                # the megacore / v7x 2-TC split.
                dimension_semantics=("parallel", "arbitrary"),
                vmem_limit_bytes=vmem_limit_bytes,
            ),
        )(
            x, mask3,
            prepared["wq"], prepared["bq"],
            prepared["wkv"], prepared["bkv"],
            prepared["wo"], prepared["bo"],
            prepared["ln1_g"], prepared["ln1_b"],
            prepared["wi"], prepared["bi"],
            prepared["wo2"], prepared["bo2"],
            prepared["ln2_g"], prepared["ln2_b"],
        )

    try:
        return run(True)
    except Exception:
        # pipeline_mode / Buffered(1) unsupported on this jax build: fall back
        # to default double-buffering (correctness unchanged, more VMEM).
        return run(False)


def init_params(key, hidden_size, intermediate_size):
    """Weights stored as (in, out) so x @ W matches torch Linear (x @ W^T)."""
    H, I = hidden_size, intermediate_size
    ks = jax.random.split(key, 12)
    s = 0.02
    n = lambda k, shape: s * jax.random.normal(k, shape, jnp.float32)
    return {
        "wq": n(ks[0], (H, H)), "bq": n(ks[1], (1, H)),
        "wk": n(ks[2], (H, H)), "bk": n(ks[3], (1, H)),
        "wv": n(ks[4], (H, H)), "bv": n(ks[5], (1, H)),
        "wo": n(ks[6], (H, H)), "bo": n(ks[7], (1, H)),
        "ln1_g": jnp.ones((1, H), jnp.float32), "ln1_b": jnp.zeros((1, H), jnp.float32),
        "wi": n(ks[8], (H, I)), "bi": n(ks[9], (1, I)),
        "wo2": n(ks[10], (I, H)), "bo2": n(ks[11], (1, H)),
        "ln2_g": jnp.ones((1, H), jnp.float32), "ln2_b": jnp.zeros((1, H), jnp.float32),
    }


def reference_bert_layer(x, attn_mask, params, *, num_heads, ln_eps=1e-12):
    """Pure-JAX reference mirroring the torch BertLayer (eval mode, post-norm)."""
    B, S, H = x.shape
    d = H // num_heads
    q = x @ params["wq"] + params["bq"]
    k = x @ params["wk"] + params["bk"]
    v = x @ params["wv"] + params["bv"]
    split = lambda t: t.reshape(B, S, num_heads, d).transpose(0, 2, 1, 3)
    qh, kh, vh = split(q) / math.sqrt(d), split(k), split(v)
    scores = jnp.einsum("bhqd,bhkd->bhqk", qh, kh) + attn_mask[:, None, None, :]
    probs = jax.nn.softmax(scores, axis=-1)
    ctx = jnp.einsum("bhqk,bhkd->bhqd", probs, vh).transpose(0, 2, 1, 3).reshape(B, S, H)
    attn = ctx @ params["wo"] + params["bo"]
    a = _layer_norm(attn + x, params["ln1_g"], params["ln1_b"], ln_eps)
    inter = _gelu_tanh(a @ params["wi"] + params["bi"])
    ffn = inter @ params["wo2"] + params["bo2"]
    return _layer_norm(ffn + a, params["ln2_g"], params["ln2_b"], ln_eps)


if __name__ == "__main__":
    # Small BERT-like config: hidden=32, heads=4 (head_dim=8), ffn=128, seq=8, batch=2.
    B, S, H, NH = 2, 8, 32, 4
    I = 4 * H

    key = jax.random.PRNGKey(0)
    k_x, k_p = jax.random.split(key, 2)

    x = jax.random.normal(k_x, (B, S, H), jnp.float32)
    # Additive attention mask: 0 for visible, -10000 for masked (last 2 of batch 1).
    mask = jnp.zeros((B, S), jnp.float32).at[1, -2:].set(-10000.0)

    params = init_params(k_p, H, I)

    with jax.default_matmul_precision("highest"):
        ref = reference_bert_layer(x, mask, params, num_heads=NH)

    # f32 MXU-operand path (tight tolerance).
    prep_f32 = prepare_params(params, num_heads=NH, compute_dtype=jnp.float32)
    out_f32 = jax.block_until_ready(bert_layer(x, mask, prep_f32))
    assert out_f32.shape == (B, S, H)
    assert bool(jnp.allclose(out_f32, ref, atol=5e-3, rtol=5e-3)), "f32 mismatch vs reference"

    # Default bf16 MXU-operand path (f32 accumulation) -- looser tolerance.
    prep_bf16 = prepare_params(params, num_heads=NH)  # compute_dtype=bf16 default
    out_bf16 = jax.block_until_ready(bert_layer(x, mask, prep_bf16))
    assert out_bf16.shape == (B, S, H)
    assert bool(jnp.allclose(out_bf16, ref, atol=5e-2, rtol=5e-2)), "bf16 mismatch vs reference"

    # TODO(synk): attention-probs dropout / head_mask / history_state /
    # output_attentions paths omitted (identity or None in eval here).
    print("KERNEL_OK")
</pallas_src>

<mosaic_0001>
module attributes {stable_mosaic.version = 11 : i64} {
  func.func @bert_layer_kernel(%arg0: i32, %arg1: i32, %arg2: memref<1x8x32xf32, #tpu.memory_space<vmem>>, %arg3: memref<1x1x8xf32, #tpu.memory_space<vmem>>, %arg4: memref<32x32xf32, #tpu.memory_space<vmem>>, %arg5: memref<1x32xf32, #tpu.memory_space<vmem>>, %arg6: memref<32x64xf32, #tpu.memory_space<vmem>>, %arg7: memref<1x64xf32, #tpu.memory_space<vmem>>, %arg8: memref<32x32xf32, #tpu.memory_space<vmem>>, %arg9: memref<1x32xf32, #tpu.memory_space<vmem>>, %arg10: memref<1x32xf32, #tpu.memory_space<vmem>>, %arg11: memref<1x32xf32, #tpu.memory_space<vmem>>, %arg12: memref<32x128xf32, #tpu.memory_space<vmem>>, %arg13: memref<1x128xf32, #tpu.memory_space<vmem>>, %arg14: memref<128x32xf32, #tpu.memory_space<vmem>>, %arg15: memref<1x32xf32, #tpu.memory_space<vmem>>, %arg16: memref<1x32xf32, #tpu.memory_space<vmem>>, %arg17: memref<1x32xf32, #tpu.memory_space<vmem>>, %arg18: memref<1x8x32xf32, #tpu.memory_space<vmem>>, %arg19: memref<4x8x8xf32, #tpu.memory_space<vmem>>, %arg20: memref<4x8x8xf32, #tpu.memory_space<vmem>>) attributes {dimension_semantics = [#tpu.dimension_semantics<parallel>, #tpu.dimension_semantics<arbitrary>], iteration_bounds = array<i64: 2, 1>, scalar_prefetch = 0 : i64, scratch_operands = 2 : i64, tpu.core_type = #tpu.core_type<tc>, window_params = [{transform_indices = @transform_0, window_bounds = array<i64: 1, 8, 32>}, {transform_indices = @transform_1, window_bounds = array<i64: 1, 1, 8>}, {pipeline_mode = #tpu.pipeline_mode<synchronous>, transform_indices = @transform_2, window_bounds = array<i64: 32, 32>}, {pipeline_mode = #tpu.pipeline_mode<synchronous>, transform_indices = @transform_3, window_bounds = array<i64: 1, 32>}, {pipeline_mode = #tpu.pipeline_mode<synchronous>, transform_indices = @transform_4, window_bounds = array<i64: 32, 64>}, {pipeline_mode = #tpu.pipeline_mode<synchronous>, transform_indices = @transform_5, window_bounds = array<i64: 1, 64>}, {pipeline_mode = #tpu.pipeline_mode<synchronous>, transform_indices = @transform_6, window_bounds = array<i64: 32, 32>}, {pipeline_mode = #tpu.pipeline_mode<synchronous>, transform_indices = @transform_7, window_bounds = array<i64: 1, 32>}, {pipeline_mode = #tpu.pipeline_mode<synchronous>, transform_indices = @transform_8, window_bounds = array<i64: 1, 32>}, {pipeline_mode = #tpu.pipeline_mode<synchronous>, transform_indices = @transform_9, window_bounds = array<i64: 1, 32>}, {pipeline_mode = #tpu.pipeline_mode<synchronous>, transform_indices = @transform_10, window_bounds = array<i64: 32, 128>}, {pipeline_mode = #tpu.pipeline_mode<synchronous>, transform_indices = @transform_11, window_bounds = array<i64: 1, 128>}, {pipeline_mode = #tpu.pipeline_mode<synchronous>, transform_indices = @transform_12, window_bounds = array<i64: 128, 32>}, {pipeline_mode = #tpu.pipeline_mode<synchronous>, transform_indices = @transform_13, window_bounds = array<i64: 1, 32>}, {pipeline_mode = #tpu.pipeline_mode<synchronous>, transform_indices = @transform_14, window_bounds = array<i64: 1, 32>}, {pipeline_mode = #tpu.pipeline_mode<synchronous>, transform_indices = @transform_15, window_bounds = array<i64: 1, 32>}, {transform_indices = @transform_16, window_bounds = array<i64: 1, 8, 32>}]} {
    %c0_i32 = arith.constant 0 : i32
    %0 = arith.cmpi eq, %arg1, %c0_i32 : i32
    %1 = arith.extui %0 : i1 to i32
    %c0_i32_0 = arith.constant 0 : i32
    %2 = arith.cmpi ne, %1, %c0_i32_0 : i32
    scf.if %2 {
      %c0_59 = arith.constant 0 : index
      %c0_60 = arith.constant 0 : index
      %c0_61 = arith.constant 0 : index
      %117 = vector.load %arg2[%c0_59, %c0_60, %c0_61] : memref<1x8x32xf32, #tpu.memory_space<vmem>>, vector<1x8x32xf32>
      %118 = vector.shape_cast %117 : vector<1x8x32xf32> to vector<8x32xf32>
      %c0_62 = arith.constant 0 : index
      %c0_63 = arith.constant 0 : index
      %119 = vector.load %arg6[%c0_62, %c0_63] : memref<32x64xf32, #tpu.memory_space<vmem>>, vector<32x64xf32>
      %cst_64 = arith.constant dense<0.000000e+00> : vector<8x64xf32>
      %120 = tpu.matmul %118, %119, %cst_64 {dimension_numbers = #tpu.dot_dimension_numbers<[1], [0], [0], [1], [0, 0, 1, 1], [], []>} : vector<8x32xf32>, vector<32x64xf32>, vector<8x64xf32> -> vector<8x64xf32>
      %c0_65 = arith.constant 0 : index
      %c0_66 = arith.constant 0 : index
      %121 = vector.load %arg7[%c0_65, %c0_66] : memref<1x64xf32, #tpu.memory_space<vmem>>, vector<1x64xf32>
      %122 = vector.broadcast %121 : vector<1x64xf32> to vector<8x64xf32>
      %123 = arith.addf %120, %122 : vector<8x64xf32>
      %124 = vector.extract_strided_slice %123 {offsets = [0, 0], sizes = [8, 32], strides = [1, 1]} : vector<8x64xf32> to vector<8x32xf32>
      %125 = vector.shape_cast %124 : vector<8x32xf32> to vector<8x4x8xf32>
      %126 = tpu.transpose %125, [1, 0, 2] : vector<8x4x8xf32> -> vector<4x8x8xf32>
      %c0_67 = arith.constant 0 : index
      %c0_68 = arith.constant 0 : index
      %c0_69 = arith.constant 0 : index
      %127 = vector.load %arg19[%c0_67, %c0_68, %c0_69] : memref<4x8x8xf32, #tpu.memory_space<vmem>>, vector<4x8x8xf32>
      tpu.vector_store %arg19[%c0_67, %c0_68, %c0_69], %126 {strides = array<i32>} : memref<4x8x8xf32, #tpu.memory_space<vmem>>, vector<4x8x8xf32>,
      %128 = vector.extract_strided_slice %123 {offsets = [0, 32], sizes = [8, 32], strides = [1, 1]} : vector<8x64xf32> to vector<8x32xf32>
      %129 = vector.shape_cast %128 : vector<8x32xf32> to vector<8x4x8xf32>
      %130 = tpu.transpose %129, [1, 0, 2] : vector<8x4x8xf32> -> vector<4x8x8xf32>
      %c0_70 = arith.constant 0 : index
      %c0_71 = arith.constant 0 : index
      %c0_72 = arith.constant 0 : index
      %131 = vector.load %arg20[%c0_70, %c0_71, %c0_72] : memref<4x8x8xf32, #tpu.memory_space<vmem>>, vector<4x8x8xf32>
      tpu.vector_store %arg20[%c0_70, %c0_71, %c0_72], %130 {strides = array<i32>} : memref<4x8x8xf32, #tpu.memory_space<vmem>>, vector<4x8x8xf32>,
    } else {
    }
    %c8_i32 = arith.constant 8 : i32
    %3 = arith.muli %arg1, %c8_i32 : i32
    %4 = tpu.assume_multiple %3, 8 : i32
    %c0 = arith.constant 0 : index
    %5 = arith.index_cast %4 : i32 to index
    %c0_1 = arith.constant 0 : index
    %6 = vector.load %arg2[%c0, %5, %c0_1] : memref<1x8x32xf32, #tpu.memory_space<vmem>>, vector<1x8x32xf32>
    %7 = vector.shape_cast %6 : vector<1x8x32xf32> to vector<8x32xf32>
    %c0_2 = arith.constant 0 : index
    %c0_3 = arith.constant 0 : index
    %c0_4 = arith.constant 0 : index
    %8 = vector.load %arg3[%c0_2, %c0_3, %c0_4] : memref<1x1x8xf32, #tpu.memory_space<vmem>>, vector<1x1x8xf32>
    %9 = vector.shape_cast %8 : vector<1x1x8xf32> to vector<1x8xf32>
    %c0_5 = arith.constant 0 : index
    %c0_6 = arith.constant 0 : index
    %10 = vector.load %arg4[%c0_5, %c0_6] : memref<32x32xf32, #tpu.memory_space<vmem>>, vector<32x32xf32>
    %cst = arith.constant dense<0.000000e+00> : vector<8x32xf32>
    %11 = tpu.matmul %7, %10, %cst {dimension_numbers = #tpu.dot_dimension_numbers<[1], [0], [0], [1], [0, 0, 1, 1], [], []>} : vector<8x32xf32>, vector<32x32xf32>, vector<8x32xf32> -> vector<8x32xf32>
    %c0_7 = arith.constant 0 : index
    %c0_8 = arith.constant 0 : index
    %12 = vector.load %arg5[%c0_7, %c0_8] : memref<1x32xf32, #tpu.memory_space<vmem>>, vector<1x32xf32>
    %13 = vector.broadcast %12 : vector<1x32xf32> to vector<8x32xf32>
    %14 = arith.addf %11, %13 : vector<8x32xf32>
    %15 = vector.shape_cast %14 : vector<8x32xf32> to vector<8x4x8xf32>
    %16 = tpu.transpose %15, [1, 0, 2] : vector<8x4x8xf32> -> vector<4x8x8xf32>
    %c0_9 = arith.constant 0 : index
    %c0_10 = arith.constant 0 : index
    %c0_11 = arith.constant 0 : index
    %17 = vector.load %arg19[%c0_9, %c0_10, %c0_11] : memref<4x8x8xf32, #tpu.memory_space<vmem>>, vector<4x8x8xf32>
    %c0_12 = arith.constant 0 : index
    %c0_13 = arith.constant 0 : index
    %c0_14 = arith.constant 0 : index
    %18 = vector.load %arg20[%c0_12, %c0_13, %c0_14] : memref<4x8x8xf32, #tpu.memory_space<vmem>>, vector<4x8x8xf32>
    "tpu.trace_start"() <{level = 10 : i32, message = "hqd,hkd->hqk"}> : () -> ()
    %cst_15 = arith.constant dense<0.000000e+00> : vector<4x8x8xf32>
    %19 = tpu.matmul %16, %17, %cst_15 {dimension_numbers = #tpu.dot_dimension_numbers<[2], [2], [1], [1], [0, 0, 0, 1, 1, 1], [0], [0]>} : vector<4x8x8xf32>, vector<4x8x8xf32>, vector<4x8x8xf32> -> vector<4x8x8xf32>
    "tpu.trace_stop"() : () -> ()
    %20 = vector.shape_cast %9 : vector<1x8xf32> to vector<1x1x8xf32>
    %21 = vector.broadcast %20 : vector<1x1x8xf32> to vector<4x8x8xf32>
    %22 = arith.addf %19, %21 : vector<4x8x8xf32>
    %cst_16 = arith.constant dense<0xFF800000> : vector<4x8xf32>
    %23 = vector.multi_reduction <maximumf>, %22, %cst_16 [2] : vector<4x8x8xf32> to vector<4x8xf32>
    %24 = vector.shape_cast %23 : vector<4x8xf32> to vector<4x8x1xf32>
    %25 = vector.broadcast %24 : vector<4x8x1xf32> to vector<4x8x8xf32>
    %26 = arith.subf %22, %25 : vector<4x8x8xf32>
    %27 = math.exp %26 : vector<4x8x8xf32>
    %cst_17 = arith.constant dense<0.000000e+00> : vector<4x8xf32>
    %28 = vector.multi_reduction <add>, %27, %cst_17 [2] : vector<4x8x8xf32> to vector<4x8xf32>
    %29 = vector.shape_cast %28 : vector<4x8xf32> to vector<4x8x1xf32>
    "tpu.trace_start"() <{level = 10 : i32, message = "hqk,hkd->hqd"}> : () -> ()
    %cst_18 = arith.constant dense<0.000000e+00> : vector<4x8x8xf32>
    %30 = tpu.matmul %27, %18, %cst_18 {dimension_numbers = #tpu.dot_dimension_numbers<[2], [1], [1], [2], [0, 0, 0, 1, 1, 2], [0], [0]>} : vector<4x8x8xf32>, vector<4x8x8xf32>, vector<4x8x8xf32> -> vector<4x8x8xf32>
    "tpu.trace_stop"() : () -> ()
    %31 = tpu.reciprocal %29 {approx = true} : vector<4x8x1xf32> -> vector<4x8x1xf32>
    %32 = vector.broadcast %31 : vector<4x8x1xf32> to vector<4x8x8xf32>
    %33 = arith.mulf %30, %32 : vector<4x8x8xf32>
    %34 = tpu.transpose %33, [1, 0, 2] : vector<4x8x8xf32> -> vector<8x4x8xf32>
    %35 = vector.shape_cast %34 : vector<8x4x8xf32> to vector<8x32xf32>
    %c0_19 = arith.constant 0 : index
    %c0_20 = arith.constant 0 : index
    %36 = vector.load %arg8[%c0_19, %c0_20] : memref<32x32xf32, #tpu.memory_space<vmem>>, vector<32x32xf32>
    %cst_21 = arith.constant dense<0.000000e+00> : vector<8x32xf32>
    %37 = tpu.matmul %35, %36, %cst_21 {dimension_numbers = #tpu.dot_dimension_numbers<[1], [0], [0], [1], [0, 0, 1, 1], [], []>} : vector<8x32xf32>, vector<32x32xf32>, vector<8x32xf32> -> vector<8x32xf32>
    %c0_22 = arith.constant 0 : index
    %c0_23 = arith.constant 0 : index
    %38 = vector.load %arg9[%c0_22, %c0_23] : memref<1x32xf32, #tpu.memory_space<vmem>>, vector<1x32xf32>
    %39 = vector.broadcast %38 : vector<1x32xf32> to vector<8x32xf32>
    %40 = arith.addf %37, %39 : vector<8x32xf32>
    %41 = arith.addf %40, %7 : vector<8x32xf32>
    %c0_24 = arith.constant 0 : index
    %c0_25 = arith.constant 0 : index
    %42 = vector.load %arg10[%c0_24, %c0_25] : memref<1x32xf32, #tpu.memory_space<vmem>>, vector<1x32xf32>
    %c0_26 = arith.constant 0 : index
    %c0_27 = arith.constant 0 : index
    %43 = vector.load %arg11[%c0_26, %c0_27] : memref<1x32xf32, #tpu.memory_space<vmem>>, vector<1x32xf32>
    %cst_28 = arith.constant dense<0.000000e+00> : vector<8xf32>
    %44 = vector.multi_reduction <add>, %41, %cst_28 [1] : vector<8x32xf32> to vector<8xf32>
    %45 = vector.shape_cast %44 : vector<8xf32> to vector<8x1xf32>
    %cst_29 = arith.constant 3.200000e+01 : f32
    %46 = vector.broadcast %cst_29 : f32 to vector<8x1xf32>
    %47 = arith.divf %45, %46 : vector<8x1xf32>
    %48 = vector.broadcast %47 : vector<8x1xf32> to vector<8x32xf32>
    %49 = arith.subf %41, %48 : vector<8x32xf32>
    %50 = arith.mulf %49, %49 : vector<8x32xf32>
    %cst_30 = arith.constant dense<0.000000e+00> : vector<8xf32>
    %51 = vector.multi_reduction <add>, %50, %cst_30 [1] : vector<8x32xf32> to vector<8xf32>
    %52 = vector.shape_cast %51 : vector<8xf32> to vector<8x1xf32>
    %cst_31 = arith.constant 3.200000e+01 : f32
    %53 = vector.broadcast %cst_31 : f32 to vector<8x1xf32>
    %54 = arith.divf %52, %53 : vector<8x1xf32>
    %55 = vector.broadcast %47 : vector<8x1xf32> to vector<8x32xf32>
    %56 = arith.subf %41, %55 : vector<8x32xf32>
    %cst_32 = arith.constant 9.99999996E-13 : f32
    %57 = vector.broadcast %cst_32 : f32 to vector<8x1xf32>
    %58 = arith.addf %54, %57 : vector<8x1xf32>
    %59 = math.rsqrt %58 : vector<8x1xf32>
    %60 = vector.broadcast %59 : vector<8x1xf32> to vector<8x32xf32>
    %61 = arith.mulf %56, %60 : vector<8x32xf32>
    %62 = vector.broadcast %42 : vector<1x32xf32> to vector<8x32xf32>
    %63 = arith.mulf %61, %62 : vector<8x32xf32>
    %64 = vector.broadcast %43 : vector<1x32xf32> to vector<8x32xf32>
    %65 = arith.addf %63, %64 : vector<8x32xf32>
    %c0_33 = arith.constant 0 : index
    %c0_34 = arith.constant 0 : index
    %66 = vector.load %arg12[%c0_33, %c0_34] : memref<32x128xf32, #tpu.memory_space<vmem>>, vector<32x128xf32>
    %cst_35 = arith.constant dense<0.000000e+00> : vector<8x128xf32>
    %67 = tpu.matmul %65, %66, %cst_35 {dimension_numbers = #tpu.dot_dimension_numbers<[1], [0], [0], [1], [0, 0, 1, 1], [], []>} : vector<8x32xf32>, vector<32x128xf32>, vector<8x128xf32> -> vector<8x128xf32>
    %c0_36 = arith.constant 0 : index
    %c0_37 = arith.constant 0 : index
    %68 = vector.load %arg13[%c0_36, %c0_37] : memref<1x128xf32, #tpu.memory_space<vmem>>, vector<1x128xf32>
    %69 = vector.broadcast %68 : vector<1x128xf32> to vector<8x128xf32>
    %70 = arith.addf %67, %69 : vector<8x128xf32>
    %cst_38 = arith.constant 5.000000e-01 : f32
    %71 = vector.broadcast %cst_38 : f32 to vector<8x128xf32>
    %72 = arith.mulf %71, %70 : vector<8x128xf32>
    %73 = arith.mulf %70, %70 : vector<8x128xf32>
    %74 = arith.mulf %73, %70 : vector<8x128xf32>
    %cst_39 = arith.constant 4.471500e-02 : f32
    %75 = vector.broadcast %cst_39 : f32 to vector<8x128xf32>
    %76 = arith.mulf %75, %74 : vector<8x128xf32>
    %77 = arith.addf %70, %76 : vector<8x128xf32>
    %cst_40 = arith.constant 0.797884583 : f32
    %78 = vector.broadcast %cst_40 : f32 to vector<8x128xf32>
    %79 = arith.mulf %78, %77 : vector<8x128xf32>
    %80 = math.tanh %79 : vector<8x128xf32>
    %cst_41 = arith.constant 1.000000e+00 : f32
    %81 = vector.broadcast %cst_41 : f32 to vector<8x128xf32>
    %82 = arith.addf %81, %80 : vector<8x128xf32>
    %83 = arith.mulf %72, %82 : vector<8x128xf32>
    %c0_42 = arith.constant 0 : index
    %c0_43 = arith.constant 0 : index
    %84 = vector.load %arg14[%c0_42, %c0_43] : memref<128x32xf32, #tpu.memory_space<vmem>>, vector<128x32xf32>
    %cst_44 = arith.constant dense<0.000000e+00> : vector<8x32xf32>
    %85 = tpu.matmul %83, %84, %cst_44 {dimension_numbers = #tpu.dot_dimension_numbers<[1], [0], [0], [1], [0, 0, 1, 1], [], []>} : vector<8x128xf32>, vector<128x32xf32>, vector<8x32xf32> -> vector<8x32xf32>
    %c0_45 = arith.constant 0 : index
    %c0_46 = arith.constant 0 : index
    %86 = vector.load %arg15[%c0_45, %c0_46] : memref<1x32xf32, #tpu.memory_space<vmem>>, vector<1x32xf32>
    %87 = vector.broadcast %86 : vector<1x32xf32> to vector<8x32xf32>
    %88 = arith.addf %85, %87 : vector<8x32xf32>
    %89 = arith.addf %88, %65 : vector<8x32xf32>
    %c0_47 = arith.constant 0 : index
    %c0_48 = arith.constant 0 : index
    %90 = vector.load %arg16[%c0_47, %c0_48] : memref<1x32xf32, #tpu.memory_space<vmem>>, vector<1x32xf32>
    %c0_49 = arith.constant 0 : index
    %c0_50 = arith.constant 0 : index
    %91 = vector.load %arg17[%c0_49, %c0_50] : memref<1x32xf32, #tpu.memory_space<vmem>>, vector<1x32xf32>
    %cst_51 = arith.constant dense<0.000000e+00> : vector<8xf32>
    %92 = vector.multi_reduction <add>, %89, %cst_51 [1] : vector<8x32xf32> to vector<8xf32>
    %93 = vector.shape_cast %92 : vector<8xf32> to vector<8x1xf32>
    %cst_52 = arith.constant 3.200000e+01 : f32
    %94 = vector.broadcast %cst_52 : f32 to vector<8x1xf32>
    %95 = arith.divf %93, %94 : vector<8x1xf32>
    %96 = vector.broadcast %95 : vector<8x1xf32> to vector<8x32xf32>
    %97 = arith.subf %89, %96 : vector<8x32xf32>
    %98 = arith.mulf %97, %97 : vector<8x32xf32>
    %cst_53 = arith.constant dense<0.000000e+00> : vector<8xf32>
    %99 = vector.multi_reduction <add>, %98, %cst_53 [1] : vector<8x32xf32> to vector<8xf32>
    %100 = vector.shape_cast %99 : vector<8xf32> to vector<8x1xf32>
    %cst_54 = arith.constant 3.200000e+01 : f32
    %101 = vector.broadcast %cst_54 : f32 to vector<8x1xf32>
    %102 = arith.divf %100, %101 : vector<8x1xf32>
    %103 = vector.broadcast %95 : vector<8x1xf32> to vector<8x32xf32>
    %104 = arith.subf %89, %103 : vector<8x32xf32>
    %cst_55 = arith.constant 9.99999996E-13 : f32
    %105 = vector.broadcast %cst_55 : f32 to vector<8x1xf32>
    %106 = arith.addf %102, %105 : vector<8x1xf32>
    %107 = math.rsqrt %106 : vector<8x1xf32>
    %108 = vector.broadcast %107 : vector<8x1xf32> to vector<8x32xf32>
    %109 = arith.mulf %104, %108 : vector<8x32xf32>
    %110 = vector.broadcast %90 : vector<1x32xf32> to vector<8x32xf32>
    %111 = arith.mulf %109, %110 : vector<8x32xf32>
    %112 = vector.broadcast %91 : vector<1x32xf32> to vector<8x32xf32>
    %113 = arith.addf %111, %112 : vector<8x32xf32>
    %c0_56 = arith.constant 0 : index
    %c0_57 = arith.constant 0 : index
    %c0_58 = arith.constant 0 : index
    %114 = vector.load %arg18[%c0_56, %c0_57, %c0_58] : memref<1x8x32xf32, #tpu.memory_space<vmem>>, vector<1x8x32xf32>
    %115 = vector.shape_cast %114 : vector<1x8x32xf32> to vector<8x32xf32>
    %116 = vector.shape_cast %113 : vector<8x32xf32> to vector<1x8x32xf32>
    tpu.vector_store %arg18[%c0_56, %c0_57, %c0_58], %116 {strides = array<i32>} : memref<1x8x32xf32, #tpu.memory_space<vmem>>, vector<1x8x32xf32>,
    return
  }
  func.func @transform_0(%arg0: i32, %arg1: i32) -> (i32, i32, i32) {
    %c0_i32 = arith.constant 0 : i32
    %c0_i32_0 = arith.constant 0 : i32
    %c0_i32_1 = arith.constant 0 : i32
    return %arg0, %c0_i32, %c0_i32_0 : i32, i32, i32
  }
  func.func @transform_1(%arg0: i32, %arg1: i32) -> (i32, i32, i32) {
    %c0_i32 = arith.constant 0 : i32
    %c0_i32_0 = arith.constant 0 : i32
    %c0_i32_1 = arith.constant 0 : i32
    return %arg0, %c0_i32, %c0_i32_0 : i32, i32, i32
  }
  func.func @transform_2(%arg0: i32, %arg1: i32) -> (i32, i32) {
    %c0_i32 = arith.constant 0 : i32
    %c0_i32_0 = arith.constant 0 : i32
    %c0_i32_1 = arith.constant 0 : i32
    return %c0_i32, %c0_i32_0 : i32, i32
  }
  func.func @transform_3(%arg0: i32, %arg1: i32) -> (i32, i32) {
    %c0_i32 = arith.constant 0 : i32
    %c0_i32_0 = arith.constant 0 : i32
    %c0_i32_1 = arith.constant 0 : i32
    return %c0_i32, %c0_i32_0 : i32, i32
  }
  func.func @transform_4(%arg0: i32, %arg1: i32) -> (i32, i32) {
    %c0_i32 = arith.constant 0 : i32
    %c0_i32_0 = arith.constant 0 : i32
    %c0_i32_1 = arith.constant 0 : i32
    return %c0_i32, %c0_i32_0 : i32, i32
  }
  func.func @transform_5(%arg0: i32, %arg1: i32) -> (i32, i32) {
    %c0_i32 = arith.constant 0 : i32
    %c0_i32_0 = arith.constant 0 : i32
    %c0_i32_1 = arith.constant 0 : i32
    return %c0_i32, %c0_i32_0 : i32, i32
  }
  func.func @transform_6(%arg0: i32, %arg1: i32) -> (i32, i32) {
    %c0_i32 = arith.constant 0 : i32
    %c0_i32_0 = arith.constant 0 : i32
    %c0_i32_1 = arith.constant 0 : i32
    return %c0_i32, %c0_i32_0 : i32, i32
  }
  func.func @transform_7(%arg0: i32, %arg1: i32) -> (i32, i32) {
    %c0_i32 = arith.constant 0 : i32
    %c0_i32_0 = arith.constant 0 : i32
    %c0_i32_1 = arith.constant 0 : i32
    return %c0_i32, %c0_i32_0 : i32, i32
  }
  func.func @transform_8(%arg0: i32, %arg1: i32) -> (i32, i32) {
    %c0_i32 = arith.constant 0 : i32
    %c0_i32_0 = arith.constant 0 : i32
    %c0_i32_1 = arith.constant 0 : i32
    return %c0_i32, %c0_i32_0 : i32, i32
  }
  func.func @transform_9(%arg0: i32, %arg1: i32) -> (i32, i32) {
    %c0_i32 = arith.constant 0 : i32
    %c0_i32_0 = arith.constant 0 : i32
    %c0_i32_1 = arith.constant 0 : i32
    return %c0_i32, %c0_i32_0 : i32, i32
  }
  func.func @transform_10(%arg0: i32, %arg1: i32) -> (i32, i32) {
    %c0_i32 = arith.constant 0 : i32
    %c0_i32_0 = arith.constant 0 : i32
    %c0_i32_1 = arith.constant 0 : i32
    return %c0_i32, %c0_i32_0 : i32, i32
  }
  func.func @transform_11(%arg0: i32, %arg1: i32) -> (i32, i32) {
    %c0_i32 = arith.constant 0 : i32
    %c0_i32_0 = arith.constant 0 : i32
    %c0_i32_1 = arith.constant 0 : i32
    return %c0_i32, %c0_i32_0 : i32, i32
  }
  func.func @transform_12(%arg0: i32, %arg1: i32) -> (i32, i32) {
    %c0_i32 = arith.constant 0 : i32
    %c0_i32_0 = arith.constant 0 : i32
    %c0_i32_1 = arith.constant 0 : i32
    return %c0_i32, %c0_i32_0 : i32, i32
  }
  func.func @transform_13(%arg0: i32, %arg1: i32) -> (i32, i32) {
    %c0_i32 = arith.constant 0 : i32
    %c0_i32_0 = arith.constant 0 : i32
    %c0_i32_1 = arith.constant 0 : i32
    return %c0_i32, %c0_i32_0 : i32, i32
  }
  func.func @transform_14(%arg0: i32, %arg1: i32) -> (i32, i32) {
    %c0_i32 = arith.constant 0 : i32
    %c0_i32_0 = arith.constant 0 : i32
    %c0_i32_1 = arith.constant 0 : i32
    return %c0_i32, %c0_i32_0 : i32, i32
  }
  func.func @transform_15(%arg0: i32, %arg1: i32) -> (i32, i32) {
    %c0_i32 = arith.constant 0 : i32
    %c0_i32_0 = arith.constant 0 : i32
    %c0_i32_1 = arith.constant 0 : i32
    return %c0_i32, %c0_i32_0 : i32, i32
  }
  func.func @transform_16(%arg0: i32, %arg1: i32) -> (i32, i32, i32) {
    %c0_i32 = arith.constant 0 : i32
    %c0_i32_0 = arith.constant 0 : i32
    return %arg0, %arg1, %c0_i32 : i32, i32, i32
  }
}

module attributes {stable_mosaic.version = 11 : i64} {
  func.func @bert_layer_kernel(%arg0: i32, %arg1: i32, %arg2: memref<1x8x32xf32, #tpu.memory_space<vmem>>, %arg3: memref<1x1x8xf32, #tpu.memory_space<vmem>>, %arg4: memref<32x32xf32, #tpu.memory_space<vmem>>, %arg5: memref<1x32xf32, #tpu.memory_space<vmem>>, %arg6: memref<32x64xf32, #tpu.memory_space<vmem>>, %arg7: memref<1x64xf32, #tpu.memory_space<vmem>>, %arg8: memref<32x32xf32, #tpu.memory_space<vmem>>, %arg9: memref<1x32xf32, #tpu.memory_space<vmem>>, %arg10: memref<1x32xf32, #tpu.memory_space<vmem>>, %arg11: memref<1x32xf32, #tpu.memory_space<vmem>>, %arg12: memref<32x128xf32, #tpu.memory_space<vmem>>, %arg13: memref<1x128xf32, #tpu.memory_space<vmem>>, %arg14: memref<128x32xf32, #tpu.memory_space<vmem>>, %arg15: memref<1x32xf32, #tpu.memory_space<vmem>>, %arg16: memref<1x32xf32, #tpu.memory_space<vmem>>, %arg17: memref<1x32xf32, #tpu.memory_space<vmem>>, %arg18: memref<1x8x32xf32, #tpu.memory_space<vmem>>, %arg19: memref<4x8x8xf32, #tpu.memory_space<vmem>>, %arg20: memref<4x8x8xf32, #tpu.memory_space<vmem>>) attributes {dimension_semantics = [#tpu.dimension_semantics<parallel>, #tpu.dimension_semantics<arbitrary>], iteration_bounds = array<i64: 2, 1>, scalar_prefetch = 0 : i64, scratch_operands = 2 : i64, tpu.core_type = #tpu.core_type<tc>, window_params = [{transform_indices = @transform_0, window_bounds = array<i64: 1, 8, 32>}, {transform_indices = @transform_1, window_bounds = array<i64: 1, 1, 8>}, {pipeline_mode = #tpu.pipeline_mode<synchronous>, transform_indices = @transform_2, window_bounds = array<i64: 32, 32>}, {pipeline_mode = #tpu.pipeline_mode<synchronous>, transform_indices = @transform_3, window_bounds = array<i64: 1, 32>}, {pipeline_mode = #tpu.pipeline_mode<synchronous>, transform_indices = @transform_4, window_bounds = array<i64: 32, 64>}, {pipeline_mode = #tpu.pipeline_mode<synchronous>, transform_indices = @transform_5, window_bounds = array<i64: 1, 64>}, {pipeline_mode = #tpu.pipeline_mode<synchronous>, transform_indices = @transform_6, window_bounds = array<i64: 32, 32>}, {pipeline_mode = #tpu.pipeline_mode<synchronous>, transform_indices = @transform_7, window_bounds = array<i64: 1, 32>}, {pipeline_mode = #tpu.pipeline_mode<synchronous>, transform_indices = @transform_8, window_bounds = array<i64: 1, 32>}, {pipeline_mode = #tpu.pipeline_mode<synchronous>, transform_indices = @transform_9, window_bounds = array<i64: 1, 32>}, {pipeline_mode = #tpu.pipeline_mode<synchronous>, transform_indices = @transform_10, window_bounds = array<i64: 32, 128>}, {pipeline_mode = #tpu.pipeline_mode<synchronous>, transform_indices = @transform_11, window_bounds = array<i64: 1, 128>}, {pipeline_mode = #tpu.pipeline_mode<synchronous>, transform_indices = @transform_12, window_bounds = array<i64: 128, 32>}, {pipeline_mode = #tpu.pipeline_mode<synchronous>, transform_indices = @transform_13, window_bounds = array<i64: 1, 32>}, {pipeline_mode = #tpu.pipeline_mode<synchronous>, transform_indices = @transform_14, window_bounds = array<i64: 1, 32>}, {pipeline_mode = #tpu.pipeline_mode<synchronous>, transform_indices = @transform_15, window_bounds = array<i64: 1, 32>}, {transform_indices = @transform_16, window_bounds = array<i64: 1, 8, 32>}]} {
    %c0_i32 = arith.constant 0 : i32
    %0 = arith.cmpi eq, %arg1, %c0_i32 : i32
    %1 = arith.extui %0 : i1 to i32
    %c0_i32_0 = arith.constant 0 : i32
    %2 = arith.cmpi ne, %1, %c0_i32_0 : i32
    scf.if %2 {
      %c0_59 = arith.constant 0 : index
      %c0_60 = arith.constant 0 : index
      %c0_61 = arith.constant 0 : index
      %117 = vector.load %arg2[%c0_59, %c0_60, %c0_61] : memref<1x8x32xf32, #tpu.memory_space<vmem>>, vector<1x8x32xf32>
      %118 = vector.shape_cast %117 : vector<1x8x32xf32> to vector<8x32xf32>
      %c0_62 = arith.constant 0 : index
      %c0_63 = arith.constant 0 : index
      %119 = vector.load %arg6[%c0_62, %c0_63] : memref<32x64xf32, #tpu.memory_space<vmem>>, vector<32x64xf32>
      %cst_64 = arith.constant dense<0.000000e+00> : vector<8x64xf32>
      %120 = tpu.matmul %118, %119, %cst_64 {dimension_numbers = #tpu.dot_dimension_numbers<[1], [0], [0], [1], [0, 0, 1, 1], [], []>} : vector<8x32xf32>, vector<32x64xf32>, vector<8x64xf32> -> vector<8x64xf32>
      %c0_65 = arith.constant 0 : index
      %c0_66 = arith.constant 0 : index
      %121 = vector.load %arg7[%c0_65, %c0_66] : memref<1x64xf32, #tpu.memory_space<vmem>>, vector<1x64xf32>
      %122 = vector.broadcast %121 : vector<1x64xf32> to vector<8x64xf32>
      %123 = arith.addf %120, %122 : vector<8x64xf32>
      %124 = vector.extract_strided_slice %123 {offsets = [0, 0], sizes = [8, 32], strides = [1, 1]} : vector<8x64xf32> to vector<8x32xf32>
      %125 = vector.shape_cast %124 : vector<8x32xf32> to vector<8x4x8xf32>
      %126 = tpu.transpose %125, [1, 0, 2] : vector<8x4x8xf32> -> vector<4x8x8xf32>
      %c0_67 = arith.constant 0 : index
      %c0_68 = arith.constant 0 : index
      %c0_69 = arith.constant 0 : index
      %127 = vector.load %arg19[%c0_67, %c0_68, %c0_69] : memref<4x8x8xf32, #tpu.memory_space<vmem>>, vector<4x8x8xf32>
      tpu.vector_store %arg19[%c0_67, %c0_68, %c0_69], %126 {strides = array<i32>} : memref<4x8x8xf32, #tpu.memory_space<vmem>>, vector<4x8x8xf32>,
      %128 = vector.extract_strided_slice %123 {offsets = [0, 32], sizes = [8, 32], strides = [1, 1]} : vector<8x64xf32> to vector<8x32xf32>
      %129 = vector.shape_cast %128 : vector<8x32xf32> to vector<8x4x8xf32>
      %130 = tpu.transpose %129, [1, 0, 2] : vector<8x4x8xf32> -> vector<4x8x8xf32>
      %c0_70 = arith.constant 0 : index
      %c0_71 = arith.constant 0 : index
      %c0_72 = arith.constant 0 : index
      %131 = vector.load %arg20[%c0_70, %c0_71, %c0_72] : memref<4x8x8xf32, #tpu.memory_space<vmem>>, vector<4x8x8xf32>
      tpu.vector_store %arg20[%c0_70, %c0_71, %c0_72], %130 {strides = array<i32>} : memref<4x8x8xf32, #tpu.memory_space<vmem>>, vector<4x8x8xf32>,
    } else {
    }
    %c8_i32 = arith.constant 8 : i32
    %3 = arith.muli %arg1, %c8_i32 : i32
    %4 = tpu.assume_multiple %3, 8 : i32
    %c0 = arith.constant 0 : index
    %5 = arith.index_cast %4 : i32 to index
    %c0_1 = arith.constant 0 : index
    %6 = vector.load %arg2[%c0, %5, %c0_1] : memref<1x8x32xf32, #tpu.memory_space<vmem>>, vector<1x8x32xf32>
    %7 = vector.shape_cast %6 : vector<1x8x32xf32> to vector<8x32xf32>
    %c0_2 = arith.constant 0 : index
    %c0_3 = arith.constant 0 : index
    %c0_4 = arith.constant 0 : index
    %8 = vector.load %arg3[%c0_2, %c0_3, %c0_4] : memref<1x1x8xf32, #tpu.memory_space<vmem>>, vector<1x1x8xf32>
    %9 = vector.shape_cast %8 : vector<1x1x8xf32> to vector<1x8xf32>
    %c0_5 = arith.constant 0 : index
    %c0_6 = arith.constant 0 : index
    %10 = vector.load %arg4[%c0_5, %c0_6] : memref<32x32xf32, #tpu.memory_space<vmem>>, vector<32x32xf32>
    %cst = arith.constant dense<0.000000e+00> : vector<8x32xf32>
    %11 = tpu.matmul %7, %10, %cst {dimension_numbers = #tpu.dot_dimension_numbers<[1], [0], [0], [1], [0, 0, 1, 1], [], []>} : vector<8x32xf32>, vector<32x32xf32>, vector<8x32xf32> -> vector<8x32xf32>
    %c0_7 = arith.constant 0 : index
    %c0_8 = arith.constant 0 : index
    %12 = vector.load %arg5[%c0_7, %c0_8] : memref<1x32xf32, #tpu.memory_space<vmem>>, vector<1x32xf32>
    %13 = vector.broadcast %12 : vector<1x32xf32> to vector<8x32xf32>
    %14 = arith.addf %11, %13 : vector<8x32xf32>
    %15 = vector.shape_cast %14 : vector<8x32xf32> to vector<8x4x8xf32>
    %16 = tpu.transpose %15, [1, 0, 2] : vector<8x4x8xf32> -> vector<4x8x8xf32>
    %c0_9 = arith.constant 0 : index
    %c0_10 = arith.constant 0 : index
    %c0_11 = arith.constant 0 : index
    %17 = vector.load %arg19[%c0_9, %c0_10, %c0_11] : memref<4x8x8xf32, #tpu.memory_space<vmem>>, vector<4x8x8xf32>
    %c0_12 = arith.constant 0 : index
    %c0_13 = arith.constant 0 : index
    %c0_14 = arith.constant 0 : index
    %18 = vector.load %arg20[%c0_12, %c0_13, %c0_14] : memref<4x8x8xf32, #tpu.memory_space<vmem>>, vector<4x8x8xf32>
    "tpu.trace_start"() <{level = 10 : i32, message = "hqd,hkd->hqk"}> : () -> ()
    %cst_15 = arith.constant dense<0.000000e+00> : vector<4x8x8xf32>
    %19 = tpu.matmul %16, %17, %cst_15 {dimension_numbers = #tpu.dot_dimension_numbers<[2], [2], [1], [1], [0, 0, 0, 1, 1, 1], [0], [0]>} : vector<4x8x8xf32>, vector<4x8x8xf32>, vector<4x8x8xf32> -> vector<4x8x8xf32>
    "tpu.trace_stop"() : () -> ()
    %20 = vector.shape_cast %9 : vector<1x8xf32> to vector<1x1x8xf32>
    %21 = vector.broadcast %20 : vector<1x1x8xf32> to vector<4x8x8xf32>
    %22 = arith.addf %19, %21 : vector<4x8x8xf32>
    %cst_16 = arith.constant dense<0xFF800000> : vector<4x8xf32>
    %23 = vector.multi_reduction <maximumf>, %22, %cst_16 [2] : vector<4x8x8xf32> to vector<4x8xf32>
    %24 = vector.shape_cast %23 : vector<4x8xf32> to vector<4x8x1xf32>
    %25 = vector.broadcast %24 : vector<4x8x1xf32> to vector<4x8x8xf32>
    %26 = arith.subf %22, %25 : vector<4x8x8xf32>
    %27 = math.exp %26 : vector<4x8x8xf32>
    %cst_17 = arith.constant dense<0.000000e+00> : vector<4x8xf32>
    %28 = vector.multi_reduction <add>, %27, %cst_17 [2] : vector<4x8x8xf32> to vector<4x8xf32>
    %29 = vector.shape_cast %28 : vector<4x8xf32> to vector<4x8x1xf32>
    "tpu.trace_start"() <{level = 10 : i32, message = "hqk,hkd->hqd"}> : () -> ()
    %cst_18 = arith.constant dense<0.000000e+00> : vector<4x8x8xf32>
    %30 = tpu.matmul %27, %18, %cst_18 {dimension_numbers = #tpu.dot_dimension_numbers<[2], [1], [1], [2], [0, 0, 0, 1, 1, 2], [0], [0]>} : vector<4x8x8xf32>, vector<4x8x8xf32>, vector<4x8x8xf32> -> vector<4x8x8xf32>
    "tpu.trace_stop"() : () -> ()
    %31 = tpu.reciprocal %29 {approx = true} : vector<4x8x1xf32> -> vector<4x8x1xf32>
    %32 = vector.broadcast %31 : vector<4x8x1xf32> to vector<4x8x8xf32>
    %33 = arith.mulf %30, %32 : vector<4x8x8xf32>
    %34 = tpu.transpose %33, [1, 0, 2] : vector<4x8x8xf32> -> vector<8x4x8xf32>
    %35 = vector.shape_cast %34 : vector<8x4x8xf32> to vector<8x32xf32>
    %c0_19 = arith.constant 0 : index
    %c0_20 = arith.constant 0 : index
    %36 = vector.load %arg8[%c0_19, %c0_20] : memref<32x32xf32, #tpu.memory_space<vmem>>, vector<32x32xf32>
    %cst_21 = arith.constant dense<0.000000e+00> : vector<8x32xf32>
    %37 = tpu.matmul %35, %36, %cst_21 {dimension_numbers = #tpu.dot_dimension_numbers<[1], [0], [0], [1], [0, 0, 1, 1], [], []>} : vector<8x32xf32>, vector<32x32xf32>, vector<8x32xf32> -> vector<8x32xf32>
    %c0_22 = arith.constant 0 : index
    %c0_23 = arith.constant 0 : index
    %38 = vector.load %arg9[%c0_22, %c0_23] : memref<1x32xf32, #tpu.memory_space<vmem>>, vector<1x32xf32>
    %39 = vector.broadcast %38 : vector<1x32xf32> to vector<8x32xf32>
    %40 = arith.addf %37, %39 : vector<8x32xf32>
    %41 = arith.addf %40, %7 : vector<8x32xf32>
    %c0_24 = arith.constant 0 : index
    %c0_25 = arith.constant 0 : index
    %42 = vector.load %arg10[%c0_24, %c0_25] : memref<1x32xf32, #tpu.memory_space<vmem>>, vector<1x32xf32>
    %c0_26 = arith.constant 0 : index
    %c0_27 = arith.constant 0 : index
    %43 = vector.load %arg11[%c0_26, %c0_27] : memref<1x32xf32, #tpu.memory_space<vmem>>, vector<1x32xf32>
    %cst_28 = arith.constant dense<0.000000e+00> : vector<8xf32>
    %44 = vector.multi_reduction <add>, %41, %cst_28 [1] : vector<8x32xf32> to vector<8xf32>
    %45 = vector.shape_cast %44 : vector<8xf32> to vector<8x1xf32>
    %cst_29 = arith.constant 3.200000e+01 : f32
    %46 = vector.broadcast %cst_29 : f32 to vector<8x1xf32>
    %47 = arith.divf %45, %46 : vector<8x1xf32>
    %48 = vector.broadcast %47 : vector<8x1xf32> to vector<8x32xf32>
    %49 = arith.subf %41, %48 : vector<8x32xf32>
    %50 = arith.mulf %49, %49 : vector<8x32xf32>
    %cst_30 = arith.constant dense<0.000000e+00> : vector<8xf32>
    %51 = vector.multi_reduction <add>, %50, %cst_30 [1] : vector<8x32xf32> to vector<8xf32>
    %52 = vector.shape_cast %51 : vector<8xf32> to vector<8x1xf32>
    %cst_31 = arith.constant 3.200000e+01 : f32
    %53 = vector.broadcast %cst_31 : f32 to vector<8x1xf32>
    %54 = arith.divf %52, %53 : vector<8x1xf32>
    %55 = vector.broadcast %47 : vector<8x1xf32> to vector<8x32xf32>
    %56 = arith.subf %41, %55 : vector<8x32xf32>
    %cst_32 = arith.constant 9.99999996E-13 : f32
    %57 = vector.broadcast %cst_32 : f32 to vector<8x1xf32>
    %58 = arith.addf %54, %57 : vector<8x1xf32>
    %59 = math.rsqrt %58 : vector<8x1xf32>
    %60 = vector.broadcast %59 : vector<8x1xf32> to vector<8x32xf32>
    %61 = arith.mulf %56, %60 : vector<8x32xf32>
    %62 = vector.broadcast %42 : vector<1x32xf32> to vector<8x32xf32>
    %63 = arith.mulf %61, %62 : vector<8x32xf32>
    %64 = vector.broadcast %43 : vector<1x32xf32> to vector<8x32xf32>
    %65 = arith.addf %63, %64 : vector<8x32xf32>
    %c0_33 = arith.constant 0 : index
    %c0_34 = arith.constant 0 : index
    %66 = vector.load %arg12[%c0_33, %c0_34] : memref<32x128xf32, #tpu.memory_space<vmem>>, vector<32x128xf32>
    %cst_35 = arith.constant dense<0.000000e+00> : vector<8x128xf32>
    %67 = tpu.matmul %65, %66, %cst_35 {dimension_numbers = #tpu.dot_dimension_numbers<[1], [0], [0], [1], [0, 0, 1, 1], [], []>} : vector<8x32xf32>, vector<32x128xf32>, vector<8x128xf32> -> vector<8x128xf32>
    %c0_36 = arith.constant 0 : index
    %c0_37 = arith.constant 0 : index
    %68 = vector.load %arg13[%c0_36, %c0_37] : memref<1x128xf32, #tpu.memory_space<vmem>>, vector<1x128xf32>
    %69 = vector.broadcast %68 : vector<1x128xf32> to vector<8x128xf32>
    %70 = arith.addf %67, %69 : vector<8x128xf32>
    %cst_38 = arith.constant 5.000000e-01 : f32
    %71 = vector.broadcast %cst_38 : f32 to vector<8x128xf32>
    %72 = arith.mulf %71, %70 : vector<8x128xf32>
    %73 = arith.mulf %70, %70 : vector<8x128xf32>
    %74 = arith.mulf %73, %70 : vector<8x128xf32>
    %cst_39 = arith.constant 4.471500e-02 : f32
    %75 = vector.broadcast %cst_39 : f32 to vector<8x128xf32>
    %76 = arith.mulf %75, %74 : vector<8x128xf32>
    %77 = arith.addf %70, %76 : vector<8x128xf32>
    %cst_40 = arith.constant 0.797884583 : f32
    %78 = vector.broadcast %cst_40 : f32 to vector<8x128xf32>
    %79 = arith.mulf %78, %77 : vector<8x128xf32>
    %80 = math.tanh %79 : vector<8x128xf32>
    %cst_41 = arith.constant 1.000000e+00 : f32
    %81 = vector.broadcast %cst_41 : f32 to vector<8x128xf32>
    %82 = arith.addf %81, %80 : vector<8x128xf32>
    %83 = arith.mulf %72, %82 : vector<8x128xf32>
    %c0_42 = arith.constant 0 : index
    %c0_43 = arith.constant 0 : index
    %84 = vector.load %arg14[%c0_42, %c0_43] : memref<128x32xf32, #tpu.memory_space<vmem>>, vector<128x32xf32>
    %cst_44 = arith.constant dense<0.000000e+00> : vector<8x32xf32>
    %85 = tpu.matmul %83, %84, %cst_44 {dimension_numbers = #tpu.dot_dimension_numbers<[1], [0], [0], [1], [0, 0, 1, 1], [], []>} : vector<8x128xf32>, vector<128x32xf32>, vector<8x32xf32> -> vector<8x32xf32>
    %c0_45 = arith.constant 0 : index
    %c0_46 = arith.constant 0 : index
    %86 = vector.load %arg15[%c0_45, %c0_46] : memref<1x32xf32, #tpu.memory_space<vmem>>, vector<1x32xf32>
    %87 = vector.broadcast %86 : vector<1x32xf32> to vector<8x32xf32>
    %88 = arith.addf %85, %87 : vector<8x32xf32>
    %89 = arith.addf %88, %65 : vector<8x32xf32>
    %c0_47 = arith.constant 0 : index
    %c0_48 = arith.constant 0 : index
    %90 = vector.load %arg16[%c0_47, %c0_48] : memref<1x32xf32, #tpu.memory_space<vmem>>, vector<1x32xf32>
    %c0_49 = arith.constant 0 : index
    %c0_50 = arith.constant 0 : index
    %91 = vector.load %arg17[%c0_49, %c0_50] : memref<1x32xf32, #tpu.memory_space<vmem>>, vector<1x32xf32>
    %cst_51 = arith.constant dense<0.000000e+00> : vector<8xf32>
    %92 = vector.multi_reduction <add>, %89, %cst_51 [1] : vector<8x32xf32> to vector<8xf32>
    %93 = vector.shape_cast %92 : vector<8xf32> to vector<8x1xf32>
    %cst_52 = arith.constant 3.200000e+01 : f32
    %94 = vector.broadcast %cst_52 : f32 to vector<8x1xf32>
    %95 = arith.divf %93, %94 : vector<8x1xf32>
    %96 = vector.broadcast %95 : vector<8x1xf32> to vector<8x32xf32>
    %97 = arith.subf %89, %96 : vector<8x32xf32>
    %98 = arith.mulf %97, %97 : vector<8x32xf32>
    %cst_53 = arith.constant dense<0.000000e+00> : vector<8xf32>
    %99 = vector.multi_reduction <add>, %98, %cst_53 [1] : vector<8x32xf32> to vector<8xf32>
    %100 = vector.shape_cast %99 : vector<8xf32> to vector<8x1xf32>
    %cst_54 = arith.constant 3.200000e+01 : f32
    %101 = vector.broadcast %cst_54 : f32 to vector<8x1xf32>
    %102 = arith.divf %100, %101 : vector<8x1xf32>
    %103 = vector.broadcast %95 : vector<8x1xf32> to vector<8x32xf32>
    %104 = arith.subf %89, %103 : vector<8x32xf32>
    %cst_55 = arith.constant 9.99999996E-13 : f32
    %105 = vector.broadcast %cst_55 : f32 to vector<8x1xf32>
    %106 = arith.addf %102, %105 : vector<8x1xf32>
    %107 = math.rsqrt %106 : vector<8x1xf32>
    %108 = vector.broadcast %107 : vector<8x1xf32> to vector<8x32xf32>
    %109 = arith.mulf %104, %108 : vector<8x32xf32>
    %110 = vector.broadcast %90 : vector<1x32xf32> to vector<8x32xf32>
    %111 = arith.mulf %109, %110 : vector<8x32xf32>
    %112 = vector.broadcast %91 : vector<1x32xf32> to vector<8x32xf32>
    %113 = arith.addf %111, %112 : vector<8x32xf32>
    %c0_56 = arith.constant 0 : index
    %c0_57 = arith.constant 0 : index
    %c0_58 = arith.constant 0 : index
    %114 = vector.load %arg18[%c0_56, %c0_57, %c0_58] : memref<1x8x32xf32, #tpu.memory_space<vmem>>, vector<1x8x32xf32>
    %115 = vector.shape_cast %114 : vector<1x8x32xf32> to vector<8x32xf32>
    %116 = vector.shape_cast %113 : vector<8x32xf32> to vector<1x8x32xf32>
    tpu.vector_store %arg18[%c0_56, %c0_57, %c0_58], %116 {strides = array<i32>} : memref<1x8x32xf32, #tpu.memory_space<vmem>>, vector<1x8x32xf32>,
    return
  }
  func.func @transform_0(%arg0: i32, %arg1: i32) -> (i32, i32, i32) {
    %c0_i32 = arith.constant 0 : i32
    %c0_i32_0 = arith.constant 0 : i32
    %c0_i32_1 = arith.constant 0 : i32
    return %arg0, %c0_i32, %c0_i32_0 : i32, i32, i32
  }
  func.func @transform_1(%arg0: i32, %arg1: i32) -> (i32, i32, i32) {
    %c0_i32 = arith.constant 0 : i32
    %c0_i32_0 = arith.constant 0 : i32
    %c0_i32_1 = arith.constant 0 : i32
    return %arg0, %c0_i32, %c0_i32_0 : i32, i32, i32
  }
  func.func @transform_2(%arg0: i32, %arg1: i32) -> (i32, i32) {
    %c0_i32 = arith.constant 0 : i32
    %c0_i32_0 = arith.constant 0 : i32
    %c0_i32_1 = arith.constant 0 : i32
    return %c0_i32, %c0_i32_0 : i32, i32
  }
  func.func @transform_3(%arg0: i32, %arg1: i32) -> (i32, i32) {
    %c0_i32 = arith.constant 0 : i32
    %c0_i32_0 = arith.constant 0 : i32
    %c0_i32_1 = arith.constant 0 : i32
    return %c0_i32, %c0_i32_0 : i32, i32
  }
  func.func @transform_4(%arg0: i32, %arg1: i32) -> (i32, i32) {
    %c0_i32 = arith.constant 0 : i32
    %c0_i32_0 = arith.constant 0 : i32
    %c0_i32_1 = arith.constant 0 : i32
    return %c0_i32, %c0_i32_0 : i32, i32
  }
  func.func @transform_5(%arg0: i32, %arg1: i32) -> (i32, i32) {
    %c0_i32 = arith.constant 0 : i32
    %c0_i32_0 = arith.constant 0 : i32
    %c0_i32_1 = arith.constant 0 : i32
    return %c0_i32, %c0_i32_0 : i32, i32
  }
  func.func @transform_6(%arg0: i32, %arg1: i32) -> (i32, i32) {
    %c0_i32 = arith.constant 0 : i32
    %c0_i32_0 = arith.constant 0 : i32
    %c0_i32_1 = arith.constant 0 : i32
    return %c0_i32, %c0_i32_0 : i32, i32
  }
  func.func @transform_7(%arg0: i32, %arg1: i32) -> (i32, i32) {
    %c0_i32 = arith.constant 0 : i32
    %c0_i32_0 = arith.constant 0 : i32
    %c0_i32_1 = arith.constant 0 : i32
    return %c0_i32, %c0_i32_0 : i32, i32
  }
  func.func @transform_8(%arg0: i32, %arg1: i32) -> (i32, i32) {
    %c0_i32 = arith.constant 0 : i32
    %c0_i32_0 = arith.constant 0 : i32
    %c0_i32_1 = arith.constant 0 : i32
    return %c0_i32, %c0_i32_0 : i32, i32
  }
  func.func @transform_9(%arg0: i32, %arg1: i32) -> (i32, i32) {
    %c0_i32 = arith.constant 0 : i32
    %c0_i32_0 = arith.constant 0 : i32
    %c0_i32_1 = arith.constant 0 : i32
    return %c0_i32, %c0_i32_0 : i32, i32
  }
  func.func @transform_10(%arg0: i32, %arg1: i32) -> (i32, i32) {
    %c0_i32 = arith.constant 0 : i32
    %c0_i32_0 = arith.constant 0 : i32
    %c0_i32_1 = arith.constant 0 : i32
    return %c0_i32, %c0_i32_0 : i32, i32
  }
  func.func @transform_11(%arg0: i32, %arg1: i32) -> (i32, i32) {
    %c0_i32 = arith.constant 0 : i32
    %c0_i32_0 = arith.constant 0 : i32
    %c0_i32_1 = arith.constant 0 : i32
    return %c0_i32, %c0_i32_0 : i32, i32
  }
  func.func @transform_12(%arg0: i32, %arg1: i32) -> (i32, i32) {
    %c0_i32 = arith.constant 0 : i32
    %c0_i32_0 = arith.constant 0 : i32
    %c0_i32_1 = arith.constant 0 : i32
    return %c0_i32, %c0_i32_0 : i32, i32
  }
  func.func @transform_13(%arg0: i32, %arg1: i32) -> (i32, i32) {
    %c0_i32 = arith.constant 0 : i32
    %c0_i32_0 = arith.constant 0 : i32
    %c0_i32_1 = arith.constant 0 : i32
    return %c0_i32, %c0_i32_0 : i32, i32
  }
  func.func @transform_14(%arg0: i32, %arg1: i32) -> (i32, i32) {
    %c0_i32 = arith.constant 0 : i32
    %c0_i32_0 = arith.constant 0 : i32
    %c0_i32_1 = arith.constant 0 : i32
    return %c0_i32, %c0_i32_0 : i32, i32
  }
  func.func @transform_15(%arg0: i32, %arg1: i32) -> (i32, i32) {
    %c0_i32 = arith.constant 0 : i32
    %c0_i32_0 = arith.constant 0 : i32
    %c0_i32_1 = arith.constant 0 : i32
    return %c0_i32, %c0_i32_0 : i32, i32
  }
  func.func @transform_16(%arg0: i32, %arg1: i32) -> (i32, i32, i32) {
    %c0_i32 = arith.constant 0 : i32
    %c0_i32_0 = arith.constant 0 : i32
    return %arg0, %arg1, %c0_i32 : i32, i32, i32
  }
}

</mosaic_0001>

<bundles_post_ra>
// kernel: tpu_custom_call.1
= control target key start
LH: loop header
LB: loop body
LE: loop exit
PB: predicated region body
PF: predicated region fallthrough
CT: control target
= control target key end

     0   :  { %s2401_s0 = inlined_call_operand.vmem [shape: f32[2,8,32], index: 0, kind: input, shape index: {}]   ;;  %s2402_s1 = inlined_call_operand.vmem [shape: f32[2,1,8], index: 1, kind: input, shape index: {}]   ;;  %s2403_s2 = inlined_call_operand.vmem [shape: f32[32,32], index: 2, kind: input, shape index: {}]   ;;  %s2404_s3 = inlined_call_operand.vmem [shape: f32[1,32], index: 3, kind: input, shape index: {}]   ;;  %s2405_s4 = inlined_call_operand.vmem [shape: f32[32,64], index: 4, kind: input, shape index: {}]   ;;  %s2406_s5 = inlined_call_operand.vmem [shape: f32[1,64], index: 5, kind: input, shape index: {}]   ;;  %s2407_s6 = inlined_call_operand.vmem [shape: f32[32,32], index: 6, kind: input, shape index: {}]   ;;  %s2408_s7 = inlined_call_operand.vmem [shape: f32[1,32], index: 7, kind: input, shape index: {}]   ;;  %s2409_s8 = inlined_call_operand.vmem [shape: f32[1,32], index: 8, kind: input, shape index: {}]   ;;  %s2410_s9 = inlined_call_operand.vmem [shape: f32[1,32], index: 9, kind: input, shape index: {}]   ;;  %s2411_s10 = inlined_call_operand.vmem [shape: f32[32,128], index: 10, kind: input, shape index: {}]   ;;  %s2412_s11 = inlined_call_operand.vmem [shape: f32[1,128], index: 11, kind: input, shape index: {}]   ;;  %s2413_s12 = inlined_call_operand.vmem [shape: f32[128,32], index: 12, kind: input, shape index: {}]   ;;  %s2414_s13 = inlined_call_operand.vmem [shape: f32[1,32], index: 13, kind: input, shape index: {}]   ;;  %s2415_s14 = inlined_call_operand.vmem [shape: f32[1,32], index: 14, kind: input, shape index: {}]   ;;  %s2416_s15 = inlined_call_operand.vmem [shape: f32[1,32], index: 15, kind: input, shape index: {}]   ;;  %s2417_s16 = inlined_call_operand.hbm [shape: f32[2,8,32], index: 16, kind: output, shape index: {}]  }
   0x1   :  { %2425 = sst [smem:[#allocation14_spill]] %s2401_s0 }
   0x2   :  { %2426 = sst [smem:[#allocation15_spill]] %s2416_s15 }
   0x3   :  { %21 = vsyncpa [#allocation5], 0 }
   0x4   :  { %23 = vsyncpa [#allocation5 + $0x1], 0  ;;  %s1952_s21 = smov 0   ;;  %s1954_s22 = smov 0  }
   0x5   :  { %s1956_s23 = smov 0   ;;  %s1958_s24 = smov 0  }
   0x6   :  { %s1960_s25 = smov 0   ;;  %s1962_s26 = smov 0  }
   0x7 LB: > { %2427 = sst [smem:[#allocation7_spill]] %s1835_s21  ;;  %s1651_s27 = sadd.s32 4294967295, %s1855_s26   ;;  %s1855_s26 = sphi %s1962_s26, %s29_s26   ;;  %s1851_s25 = sphi %s1960_s25, %s2444_s25   ;;  %s1847_s24 = sphi %s1958_s24, %s2443_s24   ;;  %s1843_s23 = sphi %s1956_s23, %s2442_s23   ;;  %s1839_s22 = sphi %s1954_s22, %s2446_s22   ;;  %s1835_s21 = sphi %s1952_s21, %s2445_s21  }
   0x8   : > { %2428 = sst [smem:[#allocation8_spill]] %s1843_s23  ;;  %s1652_s28 = sadd.s32 4294967294, %s1855_s26  }
   0x9   : > { %2429 = sst [smem:[#allocation9_spill]] %s1851_s25  ;;  %s41_s29 = sadd.s32 1, %s1851_s25 }
   0xa   : > { %2430 = sst [smem:[#allocation10_spill]] %s1855_s26  ;;  %s396_s30 = sadd.s32 1, %s1843_s23 }
   0xb   : > { %p43_p0 = scmp.ge.s32.totalorder %s41_s29, 2  ;;  %p406_p1 = scmp.ne.s32.totalorder %s1843_s23, %s1839_s22 }
   0xc   : > { %p407_p2 = scmp.eq.s32.totalorder %s1651_s27, 1  ;;  %p412_p3 = scmp.ne.s32.totalorder %s1839_s22, %s1835_s21 }
   0xd   : > { %s2448_s29 = smov (%p43_p0, %s41_s29), 0  ;;  %p413_p5 = scmp.eq.s32.totalorder %s1652_s28, 1 }
   0xe   : > { %2431 = sst [smem:[#allocation11_spill]] %s2448_s29  ;;  %p1992_p4 = por %p407_p2, %p406_p1 }
   0xf   : > { %s391_s17 = ssub.s32 %s1851_s25, %s2448_s29  ;;  %p1655_p6 = scmp.ge.s32.totalorder %s1855_s26, 1 }
  0x10   : > { %p394_p7 = scmp.eq.s32.totalorder %s391_s17, 0  ;;  %p1999_p8 = por %p413_p5, %p412_p3 }
  0x11   : > { %p486_p9 = scmp.lt.s32.totalorder %s1855_s26, 3 }
  0x12   : > { %s2433_s18 = scalar_select %p1999_p8, 1, 0 }
  0x13   : > { %s2005_s19 = scalar_select %p394_p7, %s1843_s23, %s396_s30  }
  0x14   : > { %2434 = sst [smem:[#allocation12_spill]] %s2433_s18  ;;  %p487_p10 = pnand %p1655_p6, %p486_p9 }
  0x15   : > { %2435 = sst [smem:[#allocation13_spill]] %s2005_s19  ;;  %p538_p11 = scmp.lt.s32.totalorder (!%p487_p10), %s1847_s24, 1 }
  0x16   : > { %490 = sbr.rel (%p487_p10) target bundleno = 1832 (0x728), region = 84  ;;  %s2436_s26 = sld [smem:[#allocation14_spill]] (!%p487_p10) }
  0x17   : > { %s1859_s18 = smov (!%p487_p10), 120   ;;  %s1865_s27 = smov (!%p487_p10), 8  }
  0x18   : > { %s1675_s30 = sshll.u32 (!%p487_p10), %s1847_s24, 3  ;;  %s2437_s17 = sld [smem:[#allocation15_spill]] (!%p487_p10) }
  0x19   : > { %s1567_s29 = scalar_lea.hbm (!%p487_p10), %s2417_s16, %s1675_s30 }
  0x1b   : > { %v553_v0 = vld [vmem:[%s2405_s4 + $0x18] sm:$0xff]  ;;  %v552_v2 = vld [vmem:[%s2405_s4 + $0x10] sm:$0xff]  ;;  %v551_v4 = vld [vmem:[%s2405_s4 + $0x8] sm:$0xff]  ;;  %s2027_s21 = scalar_select %p538_p11, %s1847_s24, 1  ;;  %vm558_vm0 = vcmask 261120   ;;  %vm593_vm1 = vcmask 1047556  }
  0x1c   : > { %v841_v1 = vld [vmem:[%s2403_s2 + $0x18] sm:$0xff]  ;;  %574 = vmatpush.msra.mxu0 %v553_v0  ;;  %v840_v3 = vld [vmem:[%s2403_s2 + $0x10] sm:$0xff]  ;;  %v839_v5 = vld [vmem:[%s2403_s2 + $0x8] sm:$0xff]  ;;  %v1861_v16 = vmov 1983009808   ;;  %vm703_vm2 = vcmask 64512  }
  0x1d   : > { %862 = vmatpush.msra.mxu1 %v841_v1  ;;  %v550_v6 = vld [vmem:[%s2405_s4] sm:$0xff]  ;;  %s1657_s19 = sshll.u32 %s2027_s21, 3  ;;  %s544_s23 = scalar_lea.vmem %s2402_s1, %s2027_s21  ;;  %v598_v17 = vunpack.c.l.s4 %v1861_v16  ;;  %v1862_v29 = vmov 1934713408   ;;  %vm1366_vm3 = vcmask 130048   ;;  %vm1368_vm4 = vcmask 195584  }
  0x1e   : > { %575 = vmatpush.msra.mxu0 %v552_v2  ;;  %v838_v7 = vld [vmem:[%s2403_s2] sm:$0xff]  ;;  %s541_s15 = scalar_lea.vmem %s2436_s26, %s1657_s19  ;;  %s1858_s26 = smov 104   ;;  %v622_v30 = vunpack.c.l.s4 %v1862_v29 }
  0x1f   : > { %863 = vmatpush.msra.mxu1 %v840_v3  ;;  %v2043_v8 = vld [vmem:[%s541_s15] sm:$0xff]  ;;  %s1857_s15 = smov 112   ;;  %s1860_s19 = smov 96   ;;  %v2057_v24 = vunpack.c.0.s8 %v598_v17 }
  0x20   : > { %576 = vmatpush.msra.mxu0 %v551_v4  ;;  %v1744_v9 = vld [vmem:[%s2406_s5] ss:$0 sm:$0xff]  ;;  %v2067_v39 = vunpack.c.0.s8 %v622_v30  ;;  %s1863_s21 = smov 24  }
  0x21   : > { %864 = vmatpush.msra.mxu1 %v839_v5  ;;  %v1745_v10 = vld [vmem:[%s2404_s3] ss:$0 sm:$0xff] }
  0x22   : > { %577 = vmatpush.msra.mxu0 %v550_v6 }
  0x23   : > { %865 = vmatpush.msra.mxu1 %v838_v7  ;;  %1658 = vmatmul.msk.f32.vlgmr.msra.gmra.mxu0 %vm558_vm0, %v2043_v8 }
  0x24   : > { %1659 = vmatmul.msk.f32.vlgmr.msra.gmra.mxu1 %vm558_vm0, %v2043_v8 }
  0xa0   : > { %v579_v11 = vpop.f32.mrf.mxu0 }
  0xa1   : > { %v867_v12 = vpop.f32.mrf.mxu1  ;;  %v580_v13 = vadd.f32 %v1744_v9, %v579_v11 }
  0xa2   : > { %v868_v14 = vadd.f32 %v1745_v10, %v867_v12 }
  0xa3   : > { %589 = vrot.lane.b32.xlu1 %v580_v13, %s1858_s26  ;;  %583 = vrot.lane.b32.xlu0 %v580_v13, %s1859_s18  ;;  %v595_v37 = vrot.slane %v580_v13, 4 }
  0xa4   : > { %874 = vrot.lane.b32.xlu2 %v868_v14, %s1857_s15  ;;  %v883_v21 = vrot.slane %v868_v14, 4 }
  0xab   : > { %871 = vrot.lane.b32.xlu1 %v868_v14, %s1859_s18  ;;  %586 = vrot.lane.b32.xlu0 %v580_v13, %s1857_s15  ;;  %s535_s18 = sand.u32 1, %s1839_s22  }
  0xac   : > { %877 = vrot.lane.b32.xlu2 %v868_v14, %s1858_s26  ;;  %s1571_s26 = sshll.u32 %s1567_s29, 4  ;;  %s1556_s20 = scalar_lea.sflag [#allocation5], %s535_s18  ;;  %s1572_s26 = int_to_ptr.hbm [resolvable:$true] %s1571_s26 }
  0xb3   : > { %708 = vrot.lane.b32.xlu1 %v580_v13, %s1860_s19 }
  0xfe   : > { %v875_v15 = vpop.permute.xlu2 %874 }
  0xff   : > { %v880_v18 = vrot.slane %v875_v15, 4  ;;  %v884_v26 = vsel %vm593_vm1, %v875_v15, %v883_v21 }
 0x100   : > { %v892_v33 = vperm.slane %v884_v26, %v2057_v24 }
 0x101   : > { %v882_v25 = vsel %vm593_vm1, %v880_v18, %v868_v14 }
 0x102   : > { %v888_v31 = vperm.slane %v882_v25, %v2057_v24  ;;  %v919_v47 = vrot.slane %v892_v33, 4 }
 0x104   : > { %v907_v43 = vrot.slane %v888_v31, 4 }
 0x106   : > { %v878_v27 = vpop.permute.xlu2 %877 }
 0x107   : > { %v893_v34 = vrot.slane %v878_v27, 4 }
 0x115   : > { %v590_v19 = vpop.permute.xlu1 %589  ;;  %v584_v20 = vpop.permute.xlu0 %583 }
 0x116   : > { %714 = vrot.lane.b32.xlu2 %v590_v19, %s1860_s19  ;;  %v605_v22 = vrot.slane %v590_v19, 4  ;;  %v607_v23 = vrot.slane %v584_v20, 4 }
 0x118   : > { %v608_v28 = vsel %vm593_vm1, %v590_v19, %v607_v23  ;;  %v606_v32 = vsel %vm593_vm1, %v605_v22, %v584_v20 }
 0x119   : > { %v616_v35 = vperm.slane %v608_v28, %v2057_v24  ;;  %v612_v38 = vperm.slane %v606_v32, %v2057_v24 }
 0x11b   : > { %v629_v48 = vrot.slane %v616_v35, 4  ;;  %v617_v55 = vrot.slane %v612_v38, 4 }
 0x11d   : > { %v872_v36 = vpop.permute.xlu1 %871  ;;  %v587_v42 = vpop.permute.xlu0 %586 }
 0x11e   : > { %v894_v40 = vsel %vm593_vm1, %v893_v34, %v872_v36  ;;  %v895_v41 = vrot.slane %v872_v36, 4  ;;  %v592_v45 = vrot.slane %v587_v42, 4  ;;  %v596_v46 = vsel %vm593_vm1, %v587_v42, %v595_v37  ;;  %712 = vrot.lane.b32.xlu0 %v587_v42, %s1860_s19 }
 0x11f   : > { %v900_v44 = vperm.slane %v894_v40, %v2057_v24  ;;  %v604_v50 = vperm.slane %v596_v46, %v2057_v24 }
 0x120   : > { %v896_v49 = vsel %vm593_vm1, %v878_v27, %v895_v41  ;;  %v594_v54 = vsel %vm593_vm1, %v592_v45, %v580_v13 }
 0x121   : > { %v904_v51 = vperm.slane %v896_v49, %v2057_v24  ;;  %v905_v52 = vrot.slane %v900_v44, 4  ;;  %v908_v53 = vsel %vm593_vm1, %v900_v44, %v907_v43  ;;  %v600_v56 = vperm.slane %v594_v54, %v2057_v24 }
 0x122   : > { %v631_v57 = vrot.slane %v604_v50, 4  ;;  %v630_v60 = vsel %vm593_vm1, %v629_v48, %v604_v50  ;;  %v916_v62 = vperm.slane %v908_v53, %v2067_v39 }
 0x123   : > { %v917_v58 = vrot.slane %v904_v51, 4  ;;  %v920_v59 = vsel %vm593_vm1, %v904_v51, %v919_v47  ;;  %v906_v61 = vsel %vm593_vm1, %v905_v52, %v888_v31  ;;  %v618_v0 = vsel %vm593_vm1, %v617_v55, %v600_v56 }
 0x124   : > { %v928_v63 = vperm.slane %v920_v59, %v2067_v39  ;;  %v619_v2 = vrot.slane %v600_v56, 4  ;;  %v632_v3 = vsel %vm593_vm1, %v616_v35, %v631_v57  ;;  %v636_v6 = vperm.slane %v630_v60, %v2067_v39 }
 0x125   : > { %v918_v1 = vsel %vm593_vm1, %v917_v58, %v892_v33  ;;  %v912_v7 = vperm.slane %v906_v61, %v2067_v39  ;;  %v624_v10 = vperm.slane %v618_v0, %v2067_v39  ;;  %v640_v11 = vperm.slane %v632_v3, %v2067_v39 }
 0x126   : > { %v924_v4 = vperm.slane %v918_v1, %v2067_v39  ;;  %v935_v5 = vrot.slane %v928_v63, 4  ;;  %v620_v9 = vsel %vm593_vm1, %v612_v38, %v619_v2  ;;  %710 = vrot.lane.b32.xlu0 %v584_v20, %s1860_s19  ;;  %v931_v12 = vrot.slane %v916_v62, 4  ;;  %s1656_s19 = sshll.u32 %s535_s18, 3 }
 0x127   : > { %v628_v15 = vperm.slane %v620_v9, %v2067_v39  ;;  %v645_v17 = vrot.slane %v636_v6, 4  ;;  %v647_v18 = vrot.slane %v640_v11, 4  ;;  %v929_v19 = vrot.slane %v912_v7, 4  ;;  %s537_s15 = scalar_lea.vmem [#allocation4], %s1656_s19  ;;  %s1797_s19 = scalar_lea.hbm %s2417_s16, 16 }
 0x128   : > { %v933_v13 = vrot.slane %v924_v4, 4  ;;  %v936_v14 = vsel %vm593_vm1, 0.0, %v935_v5  ;;  %v641_v21 = vrot.slane %v624_v10, 4  ;;  %v932_v25 = vsel %vm593_vm1, 0.0, %v931_v12  ;;  %s1569_s24 = sshll.u32 %s537_s15, 4  ;;  %s1570_s24 = int_to_ptr.vmem [resolvable:$true] %s1569_s24 }
 0x129   : > { %v953_v16 = vrot.slane %v936_v14, 4  ;;  %v643_v22 = vrot.slane %v628_v15, 4  ;;  %v948_v26 = vsel %vm593_vm1, %v935_v5, %v924_v4  ;;  %v648_v20 = vsel %vm593_vm1, 0.0, %v647_v18 }
 0x12a   : > { %v934_v23 = vsel %vm593_vm1, 0.0, %v933_v13  ;;  %v660_v27 = vsel %vm593_vm1, %v647_v18, %v636_v6  ;;  %v665_v31 = vrot.slane %v648_v20, 4  ;;  %v646_v32 = vsel %vm593_vm1, 0.0, %v645_v17 }
 0x12b   : > { %v644_v28 = vsel %vm593_vm1, 0.0, %v643_v22  ;;  %v649_v29 = vsel %vm593_vm1, %v643_v22, %v624_v10  ;;  %v664_v30 = vperm.slane %v660_v27, %v2057_v24  ;;  %v954_v35 = vsel %vm593_vm1, %v953_v16, %v934_v23 }
 0x12c   : > { %v653_v33 = vperm.slane %v649_v29, %v2057_v24  ;;  %v654_v34 = vrot.slane %v644_v28, 4  ;;  %v642_v36 = vsel %vm593_vm1, 0.0, %v641_v21  ;;  %v666_v37 = vsel %vm593_vm1, %v665_v31, %v646_v32  ;;  %v709_v32 = vpop.permute.xlu1 %708 }
 0x12d   : > { %v685_v38 = vrot.slane %v664_v30, 4  ;;  %v952_v40 = vperm.slane %v948_v26, %v2057_v24  ;;  %v942_v41 = vrot.slane %v932_v25, 4  ;;  %v670_v43 = vperm.slane %v666_v37, %v2057_v24 }
 0x12e   : > { %v655_v42 = vsel %vm593_vm1, %v654_v34, %v642_v36  ;;  %v673_v44 = vrot.slane %v653_v33, 4  ;;  %v930_v45 = vsel %vm593_vm1, 0.0, %v929_v19  ;;  %v937_v46 = vsel %vm593_vm1, %v931_v12, %v912_v7 }
 0x12f   : > { %v659_v47 = vperm.slane %v655_v42, %v2057_v24  ;;  %v958_v48 = vperm.slane %v954_v35, %v2057_v24  ;;  %v683_v49 = vrot.slane %v670_v43, 4  ;;  %v686_v50 = vsel %vm593_vm1, %v670_v43, %v685_v38 }
 0x130   : > { %v694_v53 = vperm.slane %v686_v50, %v2067_v39  ;;  %v973_v54 = vrot.slane %v952_v40, 4  ;;  %v941_v55 = vperm.slane %v937_v46, %v2057_v24  ;;  %v943_v58 = vsel %vm593_vm1, %v942_v41, %v930_v45 }
 0x131   : > { %v671_v51 = vrot.slane %v659_v47, 4  ;;  %v674_v52 = vsel %vm593_vm1, %v659_v47, %v673_v44  ;;  %v684_v57 = vsel %vm593_vm1, %v683_v49, %v664_v30  ;;  %v971_v62 = vrot.slane %v958_v48, 4 }
 0x132   : > { %v682_v56 = vperm.slane %v674_v52, %v2067_v39  ;;  %v690_v60 = vperm.slane %v684_v57, %v2067_v39  ;;  %v699_v61 = vrot.slane %v694_v53, 4  ;;  %v947_v3 = vperm.slane %v943_v58, %v2057_v24 }
 0x133   : > { %v672_v59 = vsel %vm593_vm1, %v671_v51, %v653_v33  ;;  %v974_v4 = vsel %vm593_vm1, %v958_v48, %v973_v54  ;;  %v961_v9 = vrot.slane %v941_v55, 4  ;;  %v972_v10 = vsel %vm593_vm1, %v971_v62, %v952_v40 }
 0x134   : > { %v678_v63 = vperm.slane %v672_v59, %v2067_v39  ;;  %v701_v0 = vrot.slane %v682_v56, 4  ;;  %v695_v1 = vrot.slane %v690_v60, 4  ;;  %v700_v2 = vsel %vm593_vm1, %v699_v61, %v682_v56 }
 0x135   : > { %706 = vst.msk [vmem:[#allocation2 + $0x10] sm:$0xff] %vm703_vm2, %v700_v2  ;;  %v982_v12 = vperm.slane %v974_v4, %v2067_v39  ;;  %v959_v13 = vrot.slane %v947_v3, 4  ;;  %v978_v14 = vperm.slane %v972_v10, %v2067_v39  ;;  %v962_v15 = vsel %vm593_vm1, %v947_v3, %v961_v9 }
 0x136   : > { %v697_v5 = vrot.slane %v678_v63, 4  ;;  %v702_v6 = vsel %vm593_vm1, %v694_v53, %v701_v0  ;;  %v696_v7 = vsel %vm593_vm1, %v695_v1, %v678_v63  ;;  %v970_v19 = vperm.slane %v962_v15, %v2067_v39 }
 0x137   : > { %707 = vst.msk [vmem:[#allocation2 + $0x18] sm:$0xff] %vm703_vm2, %v702_v6  ;;  %v987_v16 = vrot.slane %v982_v12, 4  ;;  %v960_v18 = vsel %vm593_vm1, %v959_v13, %v941_v55  ;;  %v983_v21 = vrot.slane %v978_v14, 4  ;;  %v722_v35 = vrot.slane %v709_v32, 4 }
 0x138   : > { %v698_v11 = vsel %vm593_vm1, %v690_v60, %v697_v5  ;;  %704 = vst.msk [vmem:[#allocation2] sm:$0xff] %vm703_vm2, %v696_v7  ;;  %v966_v26 = vperm.slane %v960_v18, %v2067_v39  ;;  %v989_v30 = vrot.slane %v970_v19, 4 }
 0x139   : > { %705 = vst.msk [vmem:[#allocation2 + $0x8] sm:$0xff] %vm703_vm2, %v698_v11  ;;  %v988_v23 = vsel %vm593_vm1, %v987_v16, %v970_v19 }
 0x13a   : > { %v984_v20 = vsel %vm593_vm1, %v983_v21, %v966_v26  ;;  %v985_v28 = vrot.slane %v966_v26, 4  ;;  %v990_v31 = vsel %vm593_vm1, %v982_v12, %v989_v30 }
 0x13c   : > { %v993_v17 = vld [vmem:[#allocation2 + $0x10] sm:$0xff]  ;;  %v986_v29 = vsel %vm593_vm1, %v978_v14, %v985_v28 }
 0x13d   : > { %1664 = vmatpush.xpose.msk.msrb.mxu0 %vm703_vm2, %v993_v17 }
 0x13e   : > { %v994_v27 = vld [vmem:[#allocation2 + $0x18] sm:$0xff] }
 0x13f   : > { %v991_v22 = vld [vmem:[#allocation2] sm:$0xff] }
 0x140   : > { %1660 = vmatpush.xpose.msk.msra.mxu3 %vm703_vm2, %v991_v22  ;;  %v992_v25 = vld [vmem:[#allocation2 + $0x8] sm:$0xff]  ;;  %1665 = vmatmul.msk.f32.vlgmr.msrb.gmra.mxu0 %vm703_vm2, %v988_v23 }
 0x143   : > { %1661 = vmatmul.msk.f32.vlgmr.msra.gmra.mxu3 %vm703_vm2, %v984_v20 }
 0x144   : > { %1662 = vmatpush.xpose.msk.msrb.mxu3 %vm703_vm2, %v992_v25 }
 0x148   : > { %1666 = vmatpush.xpose.msk.msra.mxu3 %vm703_vm2, %v994_v27 }
 0x14b   : > { %1663 = vmatmul.msk.f32.vlgmr.msrb.gmra.mxu3 %vm703_vm2, %v986_v29 }
 0x153   : > { %1667 = vmatmul.msk.f32.vlgmr.msra.gmra.mxu3 %vm703_vm2, %v990_v31 }
 0x170   : > { %v715_v37 = vpop.permute.xlu2 %714 }
 0x171   : > { %v732_v41 = vrot.slane %v715_v37, 4 }
 0x190   : > { %v713_v33 = vpop.permute.xlu0 %712 }
 0x191   : > { %v720_v34 = vrot.slane %v713_v33, 4  ;;  %v723_v38 = vsel %vm593_vm1, %v713_v33, %v722_v35 }
 0x192   : > { %v731_v42 = vperm.slane %v723_v38, %v2057_v24 }
 0x193   : > { %v721_v36 = vsel %vm593_vm1, %v720_v34, %v709_v32 }
 0x194   : > { %v727_v40 = vperm.slane %v721_v36, %v2057_v24  ;;  %v758_v49 = vrot.slane %v731_v42, 4 }
 0x196   : > { %v746_v46 = vrot.slane %v727_v40, 4 }
 0x198   : > { %v711_v43 = vpop.permute.xlu0 %710 }
 0x199   : > { %v733_v44 = vsel %vm593_vm1, %v732_v41, %v711_v43  ;;  %v734_v45 = vrot.slane %v711_v43, 4 }
 0x19a   : > { %v739_v47 = vperm.slane %v733_v44, %v2057_v24 }
 0x19b   : > { %v735_v48 = vsel %vm593_vm1, %v715_v37, %v734_v45 }
 0x19c   : > { %v743_v50 = vperm.slane %v735_v48, %v2057_v24  ;;  %v744_v51 = vrot.slane %v739_v47, 4  ;;  %v747_v52 = vsel %vm593_vm1, %v739_v47, %v746_v46 }
 0x19d   : > { %v755_v53 = vperm.slane %v747_v52, %v2067_v39 }
 0x19e   : > { %v745_v54 = vsel %vm593_vm1, %v744_v51, %v727_v40  ;;  %v756_v55 = vrot.slane %v743_v50, 4  ;;  %v759_v56 = vsel %vm593_vm1, %v743_v50, %v758_v49 }
 0x19f   : > { %v751_v57 = vperm.slane %v745_v54, %v2067_v39  ;;  %v767_v58 = vperm.slane %v759_v56, %v2067_v39  ;;  %v770_v59 = vrot.slane %v755_v53, 4 }
 0x1a0   : > { %v757_v60 = vsel %vm593_vm1, %v756_v55, %v731_v42  ;;  %v1743_v42 = vld [vmem:[%s544_s23] ss:$0 sm:$0xff]  ;;  %s1864_s23 = smov 16  }
 0x1a1   : > { %v763_v61 = vperm.slane %v757_v60, %v2067_v39  ;;  %v768_v62 = vrot.slane %v751_v57, 4  ;;  %v771_v63 = vsel %vm593_vm1, 0.0, %v770_v59  ;;  %v774_v0 = vrot.slane %v767_v58, 4 }
 0x1a2   : > { %v776_v1 = vsel %vm593_vm1, %v770_v59, %v751_v57  ;;  %v781_v2 = vrot.slane %v771_v63, 4 }
 0x1a3   : > { %v769_v3 = vsel %vm593_vm1, 0.0, %v768_v62  ;;  %v772_v4 = vrot.slane %v763_v61, 4  ;;  %v775_v5 = vsel %vm593_vm1, 0.0, %v774_v0  ;;  %v780_v6 = vperm.slane %v776_v1, %v2057_v24 }
 0x1a4   : > { %v782_v7 = vsel %vm593_vm1, %v781_v2, %v769_v3  ;;  %v787_v9 = vsel %vm593_vm1, %v774_v0, %v763_v61  ;;  %v792_v10 = vrot.slane %v775_v5, 4 }
 0x1a5   : > { %v773_v11 = vsel %vm593_vm1, 0.0, %v772_v4  ;;  %v786_v12 = vperm.slane %v782_v7, %v2057_v24  ;;  %v791_v13 = vperm.slane %v787_v9, %v2057_v24  ;;  %v800_v14 = vrot.slane %v780_v6, 4 }
 0x1a6   : > { %v793_v15 = vsel %vm593_vm1, %v792_v10, %v773_v11 }
 0x1a7   : > { %v797_v16 = vperm.slane %v793_v15, %v2057_v24  ;;  %v798_v17 = vrot.slane %v786_v12, 4  ;;  %v801_v18 = vsel %vm593_vm1, %v786_v12, %v800_v14  ;;  %v812_v19 = vrot.slane %v791_v13, 4 }
 0x1a8   : > { %v809_v21 = vperm.slane %v801_v18, %v2067_v39 }
 0x1a9   : > { %v799_v22 = vsel %vm593_vm1, %v798_v17, %v780_v6  ;;  %v810_v23 = vrot.slane %v797_v16, 4  ;;  %v813_v25 = vsel %vm593_vm1, %v797_v16, %v812_v19 }
 0x1aa   : > { %v805_v26 = vperm.slane %v799_v22, %v2067_v39  ;;  %v821_v20 = vperm.slane %v813_v25, %v2067_v39  ;;  %v828_v27 = vrot.slane %v809_v21, 4 }
 0x1ab   : > { %v811_v28 = vsel %vm593_vm1, %v810_v23, %v791_v13 }
 0x1ac   : > { %v817_v29 = vperm.slane %v811_v28, %v2067_v39  ;;  %v824_v30 = vrot.slane %v805_v26, 4  ;;  %v826_v31 = vrot.slane %v821_v20, 4  ;;  %v829_v32 = vsel %vm593_vm1, %v821_v20, %v828_v27 }
 0x1ad   : > { %833 = vst.msk [vmem:[#allocation3 + $0x18] sm:$0xff] %vm703_vm2, %v829_v32 }
 0x1ae   : > { %v822_v33 = vrot.slane %v817_v29, 4  ;;  %v825_v34 = vsel %vm593_vm1, %v817_v29, %v824_v30  ;;  %v827_v35 = vsel %vm593_vm1, %v826_v31, %v809_v21 }
 0x1af   : > { %831 = vst.msk [vmem:[#allocation3 + $0x8] sm:$0xff] %vm703_vm2, %v825_v34 }
 0x1b0   : > { %v823_v36 = vsel %vm593_vm1, %v822_v33, %v805_v26  ;;  %832 = vst.msk [vmem:[#allocation3 + $0x10] sm:$0xff] %vm703_vm2, %v827_v35 }
 0x1b1   : > { %830 = vst.msk [vmem:[#allocation3] sm:$0xff] %vm703_vm2, %v823_v36 }
 0x1b4   : > { %v998_v37 = vld [vmem:[#allocation3 + $0x18] sm:$0xff] }
 0x1b5   : > { %1230 = vmatpush.msrb.mxu3 %v998_v37 }
 0x1b6   : > { %v996_v38 = vld [vmem:[#allocation3 + $0x8] sm:$0xff] }
 0x1b7   : > { %1184 = vmatpush.msrb.mxu1 %v996_v38  ;;  %v997_v40 = vld [vmem:[#allocation3 + $0x10] sm:$0xff] }
 0x1b8   : > { %v995_v41 = vld [vmem:[#allocation3] sm:$0xff] }
 0x1b9   : > { %1207 = vmatpush.msra.mxu1 %v997_v40  ;;  %1161 = vmatpush.msra.mxu0 %v995_v41 }
 0x1bd   : > { %v1078_v43 = vpop.f32.mrf.mxu0 }
 0x1be   : > { %v1079_v44 = vadd.f32 %v1743_v42, %v1078_v43 }
 0x1c0   : > { %v1113_v45 = vsel %vm703_vm2, %v1079_v44, -inf }
 0x1c1   : > { %1114 = vmax.xlane.f32.xlu0 %v1113_v45 }
 0x1c6   : > { %v1026_v46 = vpop.f32.mrf.mxu3 }
 0x1c7   : > { %v1027_v53 = vadd.f32 %v1743_v42, %v1026_v46 }
 0x1c9   : > { %v1107_v54 = vsel %vm703_vm2, %v1027_v53, -inf }
 0x1ce   : > { %v1052_v47 = vpop.f32.mrf.mxu3 }
 0x1cf   : > { %v1053_v48 = vadd.f32 %v1743_v42, %v1052_v47 }
 0x1d1   : > { %v1110_v49 = vsel %vm703_vm2, %v1053_v48, -inf }
 0x1d2   : > { %1111 = vmax.xlane.f32.xlu1 %v1110_v49 }
 0x1d6   : > { %v1104_v50 = vpop.f32.mrf.mxu3 }
 0x1d7   : > { %v1105_v51 = vadd.f32 %v1743_v42, %v1104_v50 }
 0x1d9   : > { %v1116_v52 = vsel %vm703_vm2, %v1105_v51, -inf }
 0x1da   : > { %1117 = vmax.xlane.f32.xlu2 %v1116_v52 }
 0x1e2   : > { %1108 = vmax.xlane.f32.xlu2 %v1107_v54 }
 0x234   : > { %v1115_v55 = vpop.xlane.xlu0 %1114 }
 0x235   : > { %v1121_v56 = vsub.f32 %v1079_v44, %v1115_v55 }
 0x237   : > { %v1127_v57 = vmul.f32 1.442695, %v1121_v56 }
 0x239   : > { %1753 = vpow2.f32 %v1127_v57 }
 0x23f   : > { %v1754_v58 = vpop.eup %1753 }
 0x240   : > { %v1137_v59 = vsel %vm703_vm2, %v1754_v58, 0.0 }
 0x241   : > { %1138 = vadd.xlane.f32.xlu1 %v1137_v59 }
 0x245   : > { %v1112_v60 = vpop.xlane.xlu1 %1111 }
 0x246   : > { %v1120_v61 = vsub.f32 %v1053_v48, %v1112_v60 }
 0x248   : > { %v1125_v62 = vmul.f32 1.442695, %v1120_v61 }
 0x24a   : > { %1755 = vpow2.f32 %v1125_v62 }
 0x24d   : > { %v1118_v63 = vpop.xlane.xlu2 %1117 }
 0x24e   : > { %v1122_v0 = vsub.f32 %v1105_v51, %v1118_v63 }
 0x250   : > { %v1756_v1 = vpop.eup %1755  ;;  %v1129_v2 = vmul.f32 1.442695, %v1122_v0 }
 0x251   : > { %1669 = vmatmul.msk.f32.vlgmr.msrb.gmra.mxu1 %vm703_vm2, %v1756_v1  ;;  %v1134_v3 = vsel %vm703_vm2, %v1756_v1, 0.0 }
 0x252   : > { %1757 = vpow2.f32 %v1129_v2  ;;  %1135 = vadd.xlane.f32.xlu1 %v1134_v3 }
 0x255   : > { %v1109_v4 = vpop.xlane.xlu2 %1108 }
 0x256   : > { %v1119_v5 = vsub.f32 %v1027_v53, %v1109_v4 }
 0x258   : > { %v1758_v6 = vpop.eup %1757  ;;  %v1123_v7 = vmul.f32 1.442695, %v1119_v5 }
 0x259   : > { %1670 = vmatmul.msk.f32.vlgmr.msra.gmra.mxu1 %vm703_vm2, %v1754_v58  ;;  %1671 = vmatmul.msk.f32.vlgmr.msrb.gmra.mxu3 %vm703_vm2, %v1758_v6  ;;  %v1140_v9 = vsel %vm703_vm2, %v1758_v6, 0.0 }
 0x25a   : > { %1759 = vpow2.f32 %v1123_v7  ;;  %1141 = vadd.xlane.f32.xlu0 %v1140_v9 }
 0x260   : > { %v1760_v10 = vpop.eup %1759 }
 0x261   : > { %1668 = vmatmul.msk.f32.vlgmr.msra.gmra.mxu0 %vm703_vm2, %v1760_v10  ;;  %v1131_v11 = vsel %vm703_vm2, %v1760_v10, 0.0 }
 0x262   : > { %1132 = vadd.xlane.f32.xlu2 %v1131_v11 }
 0x2b4   : > { %v1139_v12 = vpop.xlane.xlu1 %1138 }
 0x2c5   : > { %v1136_v14 = vpop.xlane.xlu1 %1135 }
 0x2c6   : > { %1761 = vrcp.f32 %v1136_v14 }
 0x2c7   : > { %1763 = vrcp.f32 %v1139_v12 }
 0x2cc   : > { %v1762_v17 = vpop.eup %1761 }
 0x2cd   : > { %v1142_v15 = vpop.xlane.xlu0 %1141  ;;  %v1764_v21 = vpop.eup %1763 }
 0x2ce   : > { %v1186_v13 = vpop.f32.mrf.mxu1  ;;  %1765 = vrcp.f32 %v1142_v15 }
 0x2cf   : > { %v1240_v19 = vmul.f32 %v1762_v17, %v1186_v13 }
 0x2d1   : > { %v1257_v26 = vrot.slane %v1240_v19, 4 }
 0x2d4   : > { %v1766_v23 = vpop.eup %1765 }
 0x2d5   : > { %v1133_v16 = vpop.xlane.xlu2 %1132 }
 0x2d6   : > { %1767 = vrcp.f32 %v1133_v16  ;;  %v1209_v18 = vpop.f32.mrf.mxu1 }
 0x2d7   : > { %v1241_v22 = vmul.f32 %v1764_v21, %v1209_v18 }
 0x2d9   : > { %v1243_v29 = vrot.slane %v1241_v22, 4 }
 0x2dc   : > { %v1232_v25 = vpop.f32.mrf.mxu3  ;;  %v1768_v27 = vpop.eup %1767 }
 0x2dd   : > { %v1242_v20 = vmul.f32 %v1766_v23, %v1232_v25 }
 0x2de   : > { %v1163_v28 = vpop.f32.mrf.mxu0 }
 0x2df   : > { %v1255_v30 = vrot.slane %v1242_v20, 4  ;;  %v1258_v31 = vsel %vm593_vm1, %v1242_v20, %v1257_v26  ;;  %v1239_v32 = vmul.f32 %v1768_v27, %v1163_v28 }
 0x2e0   : > { %v1266_v33 = vperm.slane %v1258_v31, %v2057_v24  ;;  %v1370_v31 = vld [vmem:[%s2407_s6] sm:$0xff] }
 0x2e1   : > { %v1256_v34 = vsel %vm593_vm1, %v1255_v30, %v1240_v19  ;;  %v1244_v35 = vsel %vm593_vm1, %v1243_v29, %v1239_v32  ;;  %v1245_v36 = vrot.slane %v1239_v32, 4  ;;  %v1373_v29 = vld [vmem:[%s2407_s6 + $0x18] sm:$0xff]  ;;  %v1371_v30 = vld [vmem:[%s2407_s6 + $0x8] sm:$0xff] }
 0x2e2   : > { %v1262_v37 = vperm.slane %v1256_v34, %v2057_v24  ;;  %v1250_v38 = vperm.slane %v1244_v35, %v2057_v24  ;;  %v1279_v42 = vrot.slane %v1266_v33, 4  ;;  %1393 = vmatpush.msrb.mxu0 %v1373_v29 }
 0x2e3   : > { %v1246_v40 = vsel %vm593_vm1, %v1241_v22, %v1245_v36 }
 0x2e4   : > { %v1267_v41 = vrot.slane %v1262_v37, 4  ;;  %v1254_v43 = vperm.slane %v1246_v40, %v2057_v24  ;;  %v1269_v44 = vrot.slane %v1250_v38, 4 }
 0x2e6   : > { %v1268_v45 = vsel %vm593_vm1, %v1267_v41, %v1250_v38  ;;  %v1270_v46 = vsel %vm593_vm1, %v1262_v37, %v1269_v44  ;;  %v1280_v47 = vsel %vm593_vm1, %v1279_v42, %v1254_v43  ;;  %v1281_v48 = vrot.slane %v1254_v43, 4  ;;  %v1746_v38 = vld [vmem:[%s2408_s7] ss:$0 sm:$0xff] }
 0x2e7   : > { %v1274_v49 = vperm.slane %v1268_v45, %v2067_v39  ;;  %v1278_v50 = vperm.slane %v1270_v46, %v2067_v39  ;;  %v1286_v51 = vperm.slane %v1280_v47, %v2067_v39  ;;  %v1866_v44 = vmov 32.0  }
 0x2e8   : > { %v1282_v52 = vsel %vm593_vm1, %v1266_v33, %v1281_v48  ;;  %1769 = vrcp.f32 %v1866_v44 }
 0x2e9   : > { %v1290_v53 = vperm.slane %v1282_v52, %v2067_v39  ;;  %v1291_v54 = vrot.slane %v1274_v49, 4  ;;  %v1293_v55 = vrot.slane %v1278_v50, 4  ;;  %v1295_v57 = vrot.slane %v1286_v51, 4 }
 0x2eb   : > { %v1294_v56 = vsel %vm593_vm1, 0.0, %v1293_v55  ;;  %v1297_v58 = vrot.slane %v1290_v53, 4  ;;  %v1299_v59 = vsel %vm593_vm1, %v1293_v55, %v1274_v49  ;;  %v1292_v62 = vsel %vm593_vm1, 0.0, %v1291_v54  ;;  %v1444_v55 = vld [vmem:[%s2411_s10 + $0x18] sm:$0xff] }
 0x2ec   : > { %v1304_v60 = vrot.slane %v1294_v56, 4  ;;  %v1303_v61 = vperm.slane %v1299_v59, %v2057_v24  ;;  %v1296_v5 = vsel %vm593_vm1, 0.0, %v1295_v57  ;;  %1464 = vmatpush.msrb.mxu1 %v1444_v55  ;;  %v1443_v56 = vld [vmem:[%s2411_s10 + $0x10] sm:$0xff]  ;;  %v1442_v57 = vld [vmem:[%s2411_s10 + $0x8] sm:$0xff]  ;;  %v1496_v59 = vld [vmem:[%s2413_s12 + $0x78] sm:$0xff] }
 0x2ed   : > { %v1298_v63 = vsel %vm593_vm1, 0.0, %v1297_v58  ;;  %v1310_v0 = vsel %vm593_vm1, %v1297_v58, %v1286_v51  ;;  %v1441_v58 = vld [vmem:[%s2411_s10] sm:$0xff]  ;;  %1501 = vmatpush.msra.mxu2 %v1496_v59 }
 0x2ee   : > { %v1305_v1 = vsel %vm593_vm1, %v1304_v60, %v1292_v62  ;;  %v1314_v2 = vperm.slane %v1310_v0, %v2057_v24  ;;  %v1315_v3 = vrot.slane %v1298_v63, 4  ;;  %v1323_v4 = vrot.slane %v1303_v61, 4  ;;  %v1770_v45 = vpop.eup %1769  ;;  %1465 = vmatpush.msrb.mxu1 %v1443_v56  ;;  %v1495_v60 = vld [vmem:[%s2413_s12 + $0x70] sm:$0xff]  ;;  %v1493_v0 = vld [vmem:[%s2413_s12 + $0x60] sm:$0xff] }
 0x2ef   : > { %v1309_v6 = vperm.slane %v1305_v1, %v2057_v24  ;;  %v1408_v46 = vmul.f32 32.0, %v1770_v45  ;;  %vm1412_vm5 = vweird.f32 %v1770_v45  ;;  %1502 = vmatpush.msra.mxu2 %v1495_v60  ;;  %v1752_v60 = vld [vmem:[%s2437_s17] ss:$0 sm:$0xff] }
 0x2f0   : > { %v1316_v7 = vsel %vm593_vm1, %v1315_v3, %v1296_v5  ;;  %v1335_v9 = vrot.slane %v1314_v2, 4  ;;  %1466 = vmatpush.msrb.mxu1 %v1442_v57 }
 0x2f1   : > { %v1320_v10 = vperm.slane %v1316_v7, %v2057_v24  ;;  %v1324_v11 = vsel %vm593_vm1, %v1309_v6, %v1323_v4  ;;  %v1321_v12 = vrot.slane %v1309_v6, 4  ;;  %v1409_v47 = vsub.f32 1.0, %v1408_v46 }
 0x2f2   : > { %v1332_v13 = vperm.slane %v1324_v11, %v2067_v39  ;;  %1467 = vmatpush.msrb.mxu1 %v1441_v58  ;;  %v1751_v58 = vld [vmem:[%s2415_s14] ss:$0 sm:$0xff] }
 0x2f3   : > { %v1336_v14 = vsel %vm593_vm1, %v1320_v10, %v1335_v9  ;;  %v1322_v15 = vsel %vm593_vm1, %v1321_v12, %v1303_v61  ;;  %v1333_v16 = vrot.slane %v1320_v10, 4  ;;  %v1410_v48 = vmul.f32 %v1770_v45, %v1409_v47  ;;  %v1494_v61 = vld [vmem:[%s2413_s12 + $0x68] sm:$0xff]  ;;  %v1747_v9 = vld [vmem:[%s2409_s8] ss:$0 sm:$0xff] }
 0x2f4   : > { %v1344_v17 = vperm.slane %v1336_v14, %v2067_v39  ;;  %v1351_v18 = vrot.slane %v1332_v13, 4  ;;  %v1328_v19 = vperm.slane %v1322_v15, %v2067_v39  ;;  %1503 = vmatpush.msra.mxu2 %v1494_v61  ;;  %v1748_v12 = vld [vmem:[%s2410_s9] ss:$0 sm:$0xff]  ;;  %v1492_v15 = vld [vmem:[%s2413_s12 + $0x58] sm:$0xff] }
 0x2f5   : > { %v1334_v21 = vsel %vm593_vm1, %v1333_v16, %v1314_v2  ;;  %v1411_v49 = vadd.f32 %v1770_v45, %v1410_v48  ;;  %v1491_v16 = vld [vmem:[%s2413_s12 + $0x50] sm:$0xff] }
 0x2f6   : > { %v1352_v22 = vsel %vm593_vm1, %v1344_v17, %v1351_v18  ;;  %v1349_v24 = vrot.slane %v1344_v17, 4  ;;  %v1340_v23 = vperm.slane %v1334_v21, %v2067_v39  ;;  %v1347_v25 = vrot.slane %v1328_v19, 4  ;;  %v1372_v39 = vld [vmem:[%s2407_s6 + $0x10] sm:$0xff]  ;;  %1504 = vmatpush.msra.mxu2 %v1493_v0  ;;  %v1490_v17 = vld [vmem:[%s2413_s12 + $0x48] sm:$0xff]  ;;  %v1489_v18 = vld [vmem:[%s2413_s12 + $0x40] sm:$0xff] }
 0x2f7   : > { %1362 = vrot.lane.b32.xlu1 %v1352_v22, %s1863_s21  ;;  %1394 = vmatpush.msrb.mxu0 %v1372_v39  ;;  %v2275_v50 = vsel %vm1412_vm5, %v1770_v45, %v1411_v49  ;;  %v1487_v21 = vld [vmem:[%s2413_s12 + $0x30] sm:$0xff]  ;;  %v1486_v22 = vld [vmem:[%s2413_s12 + $0x28] sm:$0xff]  ;;  %s1791_s21 = sshra.s32 %s1572_s26, 4  ;;  %s1792_s21 = int_to_ptr.hbm [resolvable:$true] %s1791_s21 }
 0x2f8   : > { %v1350_v26 = vsel %vm593_vm1, %v1349_v24, %v1332_v13  ;;  %v1345_v20 = vrot.slane %v1340_v23, 4  ;;  %v1348_v27 = vsel %vm593_vm1, %v1340_v23, %v1347_v25  ;;  %1505 = vmatpush.msra.mxu2 %v1492_v15  ;;  %v1485_v24 = vld [vmem:[%s2413_s12 + $0x20] sm:$0xff]  ;;  %v1484_v23 = vld [vmem:[%s2413_s12 + $0x18] sm:$0xff]  ;;  %v1483_v25 = vld [vmem:[%s2413_s12 + $0x10] sm:$0xff]  ;;  %s1793_s30 = scalar_lea.hbm %s1792_s21, 8  ;;  %p1798_p1 = scmp.lt.s32.totalorder %s1792_s21, %s2417_s16 }
 0x2f9   : > { %1358 = vrot.lane.b32.xlu0 %v1350_v26, %s1864_s23  ;;  %1354 = vrot.lane.b32.xlu2 %v1348_v27, %s1865_s27  ;;  %v1482_v26 = vld [vmem:[%s2413_s12 + $0x8] sm:$0xff]  ;;  %v1749_v27 = vld [vmem:[%s2412_s11] ss:$0 sm:$0xff]  ;;  %p1794_p12 = scmp.ne.s32.totalorder %s1792_s21, %s1793_s30  ;;  %p1799_p2 = scmp.lt.s32.totalorder %s1797_s19, %s1793_s30 }
 0x2fa   : > { %v1346_v28 = vsel %vm593_vm1, %v1345_v20, %v1328_v19  ;;  %1395 = vmatpush.msrb.mxu0 %v1371_v30  ;;  %1506 = vmatpush.msra.mxu2 %v1491_v16  ;;  %v1488_v19 = vld [vmem:[%s2413_s12 + $0x38] sm:$0xff]  ;;  %v1481_v20 = vld [vmem:[%s2413_s12] sm:$0xff] }
 0x2fb   : > { %p1795_p13 = pnand %p1794_p12, %p1992_p4  ;;  %p1800_p3 = por %p1799_p2, %p1798_p1 }
 0x2fc   : > { %1396 = vmatpush.msrb.mxu0 %v1370_v31  ;;  %1507 = vmatpush.msra.mxu2 %v1490_v17 }
 0x2fd   : > { %p1796_p0 = pneg %p1795_p13 }
 0x2fe   : > { %1508 = vmatpush.msra.mxu2 %v1489_v18 }
 0x2ff   : > { %p1801_p5 = pnand %p1800_p3, %p1796_p0 }
 0x300   : > { %1509 = vmatpush.msra.mxu2 %v1488_v19 }
 0x302   : > { %1510 = vmatpush.msra.mxu2 %v1487_v21 }
 0x304   : > { %1511 = vmatpush.msra.mxu2 %v1486_v22 }
 0x306   : > { %1512 = vmatpush.msra.mxu2 %v1485_v24 }
 0x308   : > { %1513 = vmatpush.msra.mxu2 %v1484_v23 }
 0x30a   : > { %1514 = vmatpush.msra.mxu2 %v1483_v25 }
 0x30c   : > { %1515 = vmatpush.msra.mxu2 %v1482_v26 }
 0x30e   : > { %1516 = vmatpush.msra.mxu2 %v1481_v20 }
 0x353   : > { %v1355_v32 = vpop.permute.xlu2 %1354 }
 0x354   : > { %v1365_v33 = vsel %vm703_vm2, %v1346_v28, %v1355_v32 }
 0x369   : > { %v1363_v35 = vpop.permute.xlu1 %1362 }
 0x36b   : > { %v1359_v34 = vpop.permute.xlu0 %1358 }
 0x36c   : > { %v1367_v36 = vsel %vm1366_vm3, %v1365_v33, %v1359_v34 }
 0x36d   : > { %v1369_v37 = vsel %vm1368_vm4, %v1367_v36, %v1363_v35 }
 0x36e   : > { %1672 = vmatmul.msk.f32.vlgmr.msrb.gmra.mxu0 %vm558_vm0, %v1369_v37 }
 0x3eb   : > { %v1398_v40 = vpop.f32.mrf.mxu0 }
 0x3ec   : > { %v1399_v41 = vadd.f32 %v1746_v38, %v1398_v40  ;;  %v1750_v38 = vld [vmem:[%s2414_s13] ss:$0 sm:$0xff] }
 0x3ee   : > { %v1401_v42 = vadd.f32 %v1399_v41, %v2043_v8 }
 0x3f0   : > { %v1404_v43 = vsel %vm558_vm0, %v1401_v42, 0.0 }
 0x3f1   : > { %1405 = vadd.xlane.f32.xlu0 %v1404_v43 }
 0x464   : > { %v1406_v51 = vpop.xlane.xlu0 %1405 }
 0x465   : > { %v1414_v52 = vmul.f32 %v2275_v50, %v1406_v51 }
 0x467   : > { %v1415_v53 = vsub.f32 %v1401_v42, %v1414_v52 }
 0x469   : > { %v1416_v54 = vmul.f32 %v1415_v53, %v1415_v53 }
 0x46b   : > { %v1417_v8 = vsel %vm558_vm0, %v1416_v54, 0.0 }
 0x46c   : > { %1418 = vadd.xlane.f32.xlu2 %v1417_v8 }
 0x4df   : > { %v1419_v62 = vpop.xlane.xlu2 %1418 }
 0x4e0   : > { %v1420_v63 = vmul.f32 %v1419_v62, %v2275_v50 }
 0x4e2   : > { %v1421_v1 = vadd.f32 1e-12, %v1420_v63 }
 0x4e4   : > { %1771 = vrsqrt.f32 %v1421_v1  ;;  %vm1428_vm7 = vweird.f32 %v1421_v1 }
 0x4ea   : > { %v1772_v2 = vpop.eup %1771 }
 0x4eb   : > { %v1423_v3 = vmul.f32 %v1772_v2, %v1421_v1  ;;  %vm1429_vm6 = vweird.f32 %v1772_v2 }
 0x4ec   : > { %vm1430_vm8 = vmor %vm1428_vm7, %vm1429_vm6 }
 0x4ed   : > { %v1424_v4 = vmul.f32 %v1772_v2, %v1423_v3 }
 0x4ef   : > { %v1425_v5 = vmul.f32 0.5, %v1424_v4 }
 0x4f1   : > { %v1426_v6 = vsub.f32 1.5, %v1425_v5 }
 0x4f3   : > { %v1427_v7 = vmul.f32 %v1772_v2, %v1426_v6 }
 0x4f5   : > { %v1431_v10 = vsel %vm1430_vm8, %v1772_v2, %v1427_v7 }
 0x4f6   : > { %v1432_v11 = vmul.f32 %v1431_v10, %v1415_v53 }
 0x4f8   : > { %v1436_v13 = vmul.f32 %v1747_v9, %v1432_v11 }
 0x4fa   : > { %v1440_v14 = vadd.f32 %v1748_v12, %v1436_v13 }
 0x4fc   : > { %1673 = vmatmul.msk.f32.vlgmr.msrb.gmra.mxu1 %vm558_vm0, %v1440_v14 }
 0x579   : > { %v1469_v28 = vpop.f32.mrf.mxu1 }
 0x57a   : > { %v1470_v29 = vadd.f32 %v1749_v27, %v1469_v28 }
 0x57c   : > { %v1473_v39 = vmul.f32 %v1470_v29, %v1470_v29  ;;  %v1472_v35 = vmul.f32 0.5, %v1470_v29 }
 0x57e   : > { %v1474_v30 = vmul.f32 %v1473_v39, %v1470_v29 }
 0x580   : > { %v1475_v31 = vmul.f32 0.044715, %v1474_v30 }
 0x582   : > { %v1476_v32 = vadd.f32 %v1475_v31, %v1470_v29 }
 0x584   : > { %v1477_v33 = vmul.f32 0.7978846, %v1476_v32 }
 0x586   : > { %1773 = vtanh.f32 %v1477_v33 }
 0x58c   : > { %v1774_v34 = vpop.eup %1773 }
 0x58d   : > { %v1479_v36 = vadd.f32 1.0, %v1774_v34 }
 0x58f   : > { %v1480_v37 = vmul.f32 %v1479_v36, %v1472_v35 }
 0x591   : > { %1517 = vmatmul.f32.vlgmr.msra.gmra.mxu2 %v1480_v37 }
 0x614   : > { %v1518_v40 = vpop.f32.mrf.mxu2 }
 0x615   : > { %v1519_v41 = vadd.f32 %v1750_v38, %v1518_v40 }
 0x617   : > { %v1521_v42 = vadd.f32 %v1519_v41, %v1440_v14 }
 0x619   : > { %v1524_v43 = vsel %vm558_vm0, %v1521_v42, 0.0 }
 0x61a   : > { %1525 = vadd.xlane.f32.xlu1 %v1524_v43 }
 0x68d   : > { %v1526_v44 = vpop.xlane.xlu1 %1525 }
 0x68e   : > { %v1527_v45 = vmul.f32 %v1526_v44, %v2275_v50 }
 0x690   : > { %v1528_v46 = vsub.f32 %v1521_v42, %v1527_v45 }
 0x692   : > { %v1529_v47 = vmul.f32 %v1528_v46, %v1528_v46 }
 0x694   : > { %v1530_v48 = vsel %vm558_vm0, %v1529_v47, 0.0 }
 0x695   : > { %1531 = vadd.xlane.f32.xlu0 %v1530_v48 }
 0x708   : > { %v1532_v49 = vpop.xlane.xlu0 %1531 }
 0x709   : > { %v1533_v51 = vmul.f32 %v1532_v49, %v2275_v50 }
 0x70b   : > { %v1534_v52 = vadd.f32 1e-12, %v1533_v51 }
 0x70d   : > { %1775 = vrsqrt.f32 %v1534_v52  ;;  %vm1541_vm10 = vweird.f32 %v1534_v52 }
 0x713   : > { %v1776_v53 = vpop.eup %1775 }
 0x714   : > { %v1536_v54 = vmul.f32 %v1776_v53, %v1534_v52  ;;  %vm1542_vm9 = vweird.f32 %v1776_v53 }
 0x715   : > { %vm1543_vm11 = vmor %vm1541_vm10, %vm1542_vm9 }
 0x716   : > { %v1537_v8 = vmul.f32 %v1776_v53, %v1536_v54 }
 0x718   : > { %v1538_v55 = vmul.f32 0.5, %v1537_v8 }
 0x71a   : > { %v1539_v56 = vsub.f32 1.5, %v1538_v55 }
 0x71c   : > { %v1540_v57 = vmul.f32 %v1776_v53, %v1539_v56 }
 0x71e   : > { %v1544_v50 = vsel %vm1543_vm11, %v1776_v53, %v1540_v57 }
 0x71f   : > { %v1545_v59 = vmul.f32 %v1544_v50, %v1528_v46 }
 0x721   : > { %v1549_v61 = vmul.f32 %v1751_v58, %v1545_v59 }
 0x723   : > { %v1553_v62 = vadd.f32 %v1752_v60, %v1549_v61 }
 0x725   : > { %1554 = vst.msk [vmem:[%s537_s15] sm:$0xff] %vm558_vm0, %v1553_v62 }
 0x726   : > { %1804 = shalt.err (!%p1801_p5)
}
 0x727   : > { %1678 = dma.vmem_to_hbm [thread:$0]  (%p1992_p4), %s1570_s24, 128, %s1572_s26, %s1556_s20  }
 0x728 PF: > { %s2438_s18 = sld [smem:[#allocation10_spill]] }
 0x729   : > { %s2439_s25 = sld [smem:[#allocation7_spill]] }
 0x72e   : > { %p1684_p6 = scmp.ge.s32.totalorder %s2438_s18, 2 }
 0x72f   : > { %s1583_s15 = sand.u32 1, %s2439_s25  }
 0x730   : > { %p1681_p7 = pnand %p1684_p6, %p1999_p8  ;;  %s1584_s23 = scalar_lea.sflag [#allocation5], %s1583_s15 }
 0x732   : > { %p1682_p9 = pneg %p1681_p7 }
 0x734   : > { %1830 = dma.done.wait (%p1682_p9), %s1584_s23, 128  }
 0x735   : > { %1832 = vsyncadd (%p1682_p9), %s1584_s23, 4294967168  ;;  %s29_s26 = sadd.s32 1, %s2438_s18   ;;  %s2441_s30 = sld [smem:[#allocation8_spill]] }
 0x736   : > { %p26_p10 = scmp.ge.s32.totalorder %s29_s26, 4   ;;  %s2442_s23 = sld [smem:[#allocation13_spill]] }
 0x737   : > { %s2443_s24 = sld [smem:[#allocation9_spill]]  ;;  %s2445_s21 = smov %s1839_s22 }
 0x738   : > { %s2444_s25 = sld [smem:[#allocation11_spill]]  ;;  %28 = sbr.rel (!%p26_p10) target bundleno = 7 (0x7), region = 127 }
 0x73b   : > { %s2446_s22 = smov %s2441_s30 }
 0x73d   :  { %1590 = vsyncpa [#allocation5], 1 }
 0x73e   :  { %1592 = vsyncpa [#allocation5 + $0x1], 1 }

// kernel: tpu_custom_call.1
= control target key start
LH: loop header
LB: loop body
LE: loop exit
PB: predicated region body
PF: predicated region fallthrough
CT: control target
= control target key end

     0   :  { %s2401_s0 = inlined_call_operand.vmem [shape: f32[2,8,32], index: 0, kind: input, shape index: {}]   ;;  %s2402_s1 = inlined_call_operand.vmem [shape: f32[2,1,8], index: 1, kind: input, shape index: {}]   ;;  %s2403_s2 = inlined_call_operand.vmem [shape: f32[32,32], index: 2, kind: input, shape index: {}]   ;;  %s2404_s3 = inlined_call_operand.vmem [shape: f32[1,32], index: 3, kind: input, shape index: {}]   ;;  %s2405_s4 = inlined_call_operand.vmem [shape: f32[32,64], index: 4, kind: input, shape index: {}]   ;;  %s2406_s5 = inlined_call_operand.vmem [shape: f32[1,64], index: 5, kind: input, shape index: {}]   ;;  %s2407_s6 = inlined_call_operand.vmem [shape: f32[32,32], index: 6, kind: input, shape index: {}]   ;;  %s2408_s7 = inlined_call_operand.vmem [shape: f32[1,32], index: 7, kind: input, shape index: {}]   ;;  %s2409_s8 = inlined_call_operand.vmem [shape: f32[1,32], index: 8, kind: input, shape index: {}]   ;;  %s2410_s9 = inlined_call_operand.vmem [shape: f32[1,32], index: 9, kind: input, shape index: {}]   ;;  %s2411_s10 = inlined_call_operand.vmem [shape: f32[32,128], index: 10, kind: input, shape index: {}]   ;;  %s2412_s11 = inlined_call_operand.vmem [shape: f32[1,128], index: 11, kind: input, shape index: {}]   ;;  %s2413_s12 = inlined_call_operand.vmem [shape: f32[128,32], index: 12, kind: input, shape index: {}]   ;;  %s2414_s13 = inlined_call_operand.vmem [shape: f32[1,32], index: 13, kind: input, shape index: {}]   ;;  %s2415_s14 = inlined_call_operand.vmem [shape: f32[1,32], index: 14, kind: input, shape index: {}]   ;;  %s2416_s15 = inlined_call_operand.vmem [shape: f32[1,32], index: 15, kind: input, shape index: {}]   ;;  %s2417_s16 = inlined_call_operand.hbm [shape: f32[2,8,32], index: 16, kind: output, shape index: {}]  }
   0x1   :  { %2425 = sst [smem:[#allocation14_spill]] %s2401_s0 }
   0x2   :  { %2426 = sst [smem:[#allocation15_spill]] %s2416_s15 }
   0x3   :  { %21 = vsyncpa [#allocation5], 0 }
   0x4   :  { %23 = vsyncpa [#allocation5 + $0x1], 0  ;;  %s1952_s21 = smov 0   ;;  %s1954_s22 = smov 0  }
   0x5   :  { %s1956_s23 = smov 0   ;;  %s1958_s24 = smov 0  }
   0x6   :  { %s1960_s25 = smov 0   ;;  %s1962_s26 = smov 0  }
   0x7 LB: > { %2427 = sst [smem:[#allocation7_spill]] %s1835_s21  ;;  %s1651_s27 = sadd.s32 4294967295, %s1855_s26   ;;  %s1855_s26 = sphi %s1962_s26, %s29_s26   ;;  %s1851_s25 = sphi %s1960_s25, %s2444_s25   ;;  %s1847_s24 = sphi %s1958_s24, %s2443_s24   ;;  %s1843_s23 = sphi %s1956_s23, %s2442_s23   ;;  %s1839_s22 = sphi %s1954_s22, %s2446_s22   ;;  %s1835_s21 = sphi %s1952_s21, %s2445_s21  }
   0x8   : > { %2428 = sst [smem:[#allocation8_spill]] %s1843_s23  ;;  %s1652_s28 = sadd.s32 4294967294, %s1855_s26  }
   0x9   : > { %2429 = sst [smem:[#allocation9_spill]] %s1851_s25  ;;  %s41_s29 = sadd.s32 1, %s1851_s25 }
   0xa   : > { %2430 = sst [smem:[#allocation10_spill]] %s1855_s26  ;;  %s396_s30 = sadd.s32 1, %s1843_s23 }
   0xb   : > { %p43_p0 = scmp.ge.s32.totalorder %s41_s29, 2  ;;  %p406_p1 = scmp.ne.s32.totalorder %s1843_s23, %s1839_s22 }
   0xc   : > { %p407_p2 = scmp.eq.s32.totalorder %s1651_s27, 1  ;;  %p412_p3 = scmp.ne.s32.totalorder %s1839_s22, %s1835_s21 }
   0xd   : > { %s2448_s29 = smov (%p43_p0, %s41_s29), 0  ;;  %p413_p5 = scmp.eq.s32.totalorder %s1652_s28, 1 }
   0xe   : > { %2431 = sst [smem:[#allocation11_spill]] %s2448_s29  ;;  %p1992_p4 = por %p407_p2, %p406_p1 }
   0xf   : > { %s391_s17 = ssub.s32 %s1851_s25, %s2448_s29  ;;  %p1655_p6 = scmp.ge.s32.totalorder %s1855_s26, 1 }
  0x10   : > { %p394_p7 = scmp.eq.s32.totalorder %s391_s17, 0  ;;  %p1999_p8 = por %p413_p5, %p412_p3 }
  0x11   : > { %p486_p9 = scmp.lt.s32.totalorder %s1855_s26, 3 }
  0x12   : > { %s2433_s18 = scalar_select %p1999_p8, 1, 0 }
  0x13   : > { %s2005_s19 = scalar_select %p394_p7, %s1843_s23, %s396_s30  }
  0x14   : > { %2434 = sst [smem:[#allocation12_spill]] %s2433_s18  ;;  %p487_p10 = pnand %p1655_p6, %p486_p9 }
  0x15   : > { %2435 = sst [smem:[#allocation13_spill]] %s2005_s19  ;;  %p538_p11 = scmp.lt.s32.totalorder (!%p487_p10), %s1847_s24, 1 }
  0x16   : > { %490 = sbr.rel (%p487_p10) target bundleno = 1832 (0x728), region = 84  ;;  %s2436_s26 = sld [smem:[#allocation14_spill]] (!%p487_p10) }
  0x17   : > { %s1859_s18 = smov (!%p487_p10), 120   ;;  %s1865_s27 = smov (!%p487_p10), 8  }
  0x18   : > { %s1675_s30 = sshll.u32 (!%p487_p10), %s1847_s24, 3  ;;  %s2437_s17 = sld [smem:[#allocation15_spill]] (!%p487_p10) }
  0x19   : > { %s1567_s29 = scalar_lea.hbm (!%p487_p10), %s2417_s16, %s1675_s30 }
  0x1b   : > { %v553_v0 = vld [vmem:[%s2405_s4 + $0x18] sm:$0xff]  ;;  %v552_v2 = vld [vmem:[%s2405_s4 + $0x10] sm:$0xff]  ;;  %v551_v4 = vld [vmem:[%s2405_s4 + $0x8] sm:$0xff]  ;;  %s2027_s21 = scalar_select %p538_p11, %s1847_s24, 1  ;;  %vm558_vm0 = vcmask 261120   ;;  %vm593_vm1 = vcmask 1047556  }
  0x1c   : > { %v841_v1 = vld [vmem:[%s2403_s2 + $0x18] sm:$0xff]  ;;  %574 = vmatpush.msra.mxu0 %v553_v0  ;;  %v840_v3 = vld [vmem:[%s2403_s2 + $0x10] sm:$0xff]  ;;  %v839_v5 = vld [vmem:[%s2403_s2 + $0x8] sm:$0xff]  ;;  %v1861_v16 = vmov 1983009808   ;;  %vm703_vm2 = vcmask 64512  }
  0x1d   : > { %862 = vmatpush.msra.mxu1 %v841_v1  ;;  %v550_v6 = vld [vmem:[%s2405_s4] sm:$0xff]  ;;  %s1657_s19 = sshll.u32 %s2027_s21, 3  ;;  %s544_s23 = scalar_lea.vmem %s2402_s1, %s2027_s21  ;;  %v598_v17 = vunpack.c.l.s4 %v1861_v16  ;;  %v1862_v29 = vmov 1934713408   ;;  %vm1366_vm3 = vcmask 130048   ;;  %vm1368_vm4 = vcmask 195584  }
  0x1e   : > { %575 = vmatpush.msra.mxu0 %v552_v2  ;;  %v838_v7 = vld [vmem:[%s2403_s2] sm:$0xff]  ;;  %s541_s15 = scalar_lea.vmem %s2436_s26, %s1657_s19  ;;  %s1858_s26 = smov 104   ;;  %v622_v30 = vunpack.c.l.s4 %v1862_v29 }
  0x1f   : > { %863 = vmatpush.msra.mxu1 %v840_v3  ;;  %v2043_v8 = vld [vmem:[%s541_s15] sm:$0xff]  ;;  %s1857_s15 = smov 112   ;;  %s1860_s19 = smov 96   ;;  %v2057_v24 = vunpack.c.0.s8 %v598_v17 }
  0x20   : > { %576 = vmatpush.msra.mxu0 %v551_v4  ;;  %v1744_v9 = vld [vmem:[%s2406_s5] ss:$0 sm:$0xff]  ;;  %v2067_v39 = vunpack.c.0.s8 %v622_v30  ;;  %s1863_s21 = smov 24  }
  0x21   : > { %864 = vmatpush.msra.mxu1 %v839_v5  ;;  %v1745_v10 = vld [vmem:[%s2404_s3] ss:$0 sm:$0xff] }
  0x22   : > { %577 = vmatpush.msra.mxu0 %v550_v6 }
  0x23   : > { %865 = vmatpush.msra.mxu1 %v838_v7  ;;  %1658 = vmatmul.msk.f32.vlgmr.msra.gmra.mxu0 %vm558_vm0, %v2043_v8 }
  0x24   : > { %1659 = vmatmul.msk.f32.vlgmr.msra.gmra.mxu1 %vm558_vm0, %v2043_v8 }
  0xa0   : > { %v579_v11 = vpop.f32.mrf.mxu0 }
  0xa1   : > { %v867_v12 = vpop.f32.mrf.mxu1  ;;  %v580_v13 = vadd.f32 %v1744_v9, %v579_v11 }
  0xa2   : > { %v868_v14 = vadd.f32 %v1745_v10, %v867_v12 }
  0xa3   : > { %589 = vrot.lane.b32.xlu1 %v580_v13, %s1858_s26  ;;  %583 = vrot.lane.b32.xlu0 %v580_v13, %s1859_s18  ;;  %v595_v37 = vrot.slane %v580_v13, 4 }
  0xa4   : > { %874 = vrot.lane.b32.xlu2 %v868_v14, %s1857_s15  ;;  %v883_v21 = vrot.slane %v868_v14, 4 }
  0xab   : > { %871 = vrot.lane.b32.xlu1 %v868_v14, %s1859_s18  ;;  %586 = vrot.lane.b32.xlu0 %v580_v13, %s1857_s15  ;;  %s535_s18 = sand.u32 1, %s1839_s22  }
  0xac   : > { %877 = vrot.lane.b32.xlu2 %v868_v14, %s1858_s26  ;;  %s1571_s26 = sshll.u32 %s1567_s29, 4  ;;  %s1556_s20 = scalar_lea.sflag [#allocation5], %s535_s18  ;;  %s1572_s26 = int_to_ptr.hbm [resolvable:$true] %s1571_s26 }
  0xb3   : > { %708 = vrot.lane.b32.xlu1 %v580_v13, %s1860_s19 }
  0xfe   : > { %v875_v15 = vpop.permute.xlu2 %874 }
  0xff   : > { %v880_v18 = vrot.slane %v875_v15, 4  ;;  %v884_v26 = vsel %vm593_vm1, %v875_v15, %v883_v21 }
 0x100   : > { %v892_v33 = vperm.slane %v884_v26, %v2057_v24 }
 0x101   : > { %v882_v25 = vsel %vm593_vm1, %v880_v18, %v868_v14 }
 0x102   : > { %v888_v31 = vperm.slane %v882_v25, %v2057_v24  ;;  %v919_v47 = vrot.slane %v892_v33, 4 }
 0x104   : > { %v907_v43 = vrot.slane %v888_v31, 4 }
 0x106   : > { %v878_v27 = vpop.permute.xlu2 %877 }
 0x107   : > { %v893_v34 = vrot.slane %v878_v27, 4 }
 0x115   : > { %v590_v19 = vpop.permute.xlu1 %589  ;;  %v584_v20 = vpop.permute.xlu0 %583 }
 0x116   : > { %714 = vrot.lane.b32.xlu2 %v590_v19, %s1860_s19  ;;  %v605_v22 = vrot.slane %v590_v19, 4  ;;  %v607_v23 = vrot.slane %v584_v20, 4 }
 0x118   : > { %v608_v28 = vsel %vm593_vm1, %v590_v19, %v607_v23  ;;  %v606_v32 = vsel %vm593_vm1, %v605_v22, %v584_v20 }
 0x119   : > { %v616_v35 = vperm.slane %v608_v28, %v2057_v24  ;;  %v612_v38 = vperm.slane %v606_v32, %v2057_v24 }
 0x11b   : > { %v629_v48 = vrot.slane %v616_v35, 4  ;;  %v617_v55 = vrot.slane %v612_v38, 4 }
 0x11d   : > { %v872_v36 = vpop.permute.xlu1 %871  ;;  %v587_v42 = vpop.permute.xlu0 %586 }
 0x11e   : > { %v894_v40 = vsel %vm593_vm1, %v893_v34, %v872_v36  ;;  %v895_v41 = vrot.slane %v872_v36, 4  ;;  %v592_v45 = vrot.slane %v587_v42, 4  ;;  %v596_v46 = vsel %vm593_vm1, %v587_v42, %v595_v37  ;;  %712 = vrot.lane.b32.xlu0 %v587_v42, %s1860_s19 }
 0x11f   : > { %v900_v44 = vperm.slane %v894_v40, %v2057_v24  ;;  %v604_v50 = vperm.slane %v596_v46, %v2057_v24 }
 0x120   : > { %v896_v49 = vsel %vm593_vm1, %v878_v27, %v895_v41  ;;  %v594_v54 = vsel %vm593_vm1, %v592_v45, %v580_v13 }
 0x121   : > { %v904_v51 = vperm.slane %v896_v49, %v2057_v24  ;;  %v905_v52 = vrot.slane %v900_v44, 4  ;;  %v908_v53 = vsel %vm593_vm1, %v900_v44, %v907_v43  ;;  %v600_v56 = vperm.slane %v594_v54, %v2057_v24 }
 0x122   : > { %v631_v57 = vrot.slane %v604_v50, 4  ;;  %v630_v60 = vsel %vm593_vm1, %v629_v48, %v604_v50  ;;  %v916_v62 = vperm.slane %v908_v53, %v2067_v39 }
 0x123   : > { %v917_v58 = vrot.slane %v904_v51, 4  ;;  %v920_v59 = vsel %vm593_vm1, %v904_v51, %v919_v47  ;;  %v906_v61 = vsel %vm593_vm1, %v905_v52, %v888_v31  ;;  %v618_v0 = vsel %vm593_vm1, %v617_v55, %v600_v56 }
 0x124   : > { %v928_v63 = vperm.slane %v920_v59, %v2067_v39  ;;  %v619_v2 = vrot.slane %v600_v56, 4  ;;  %v632_v3 = vsel %vm593_vm1, %v616_v35, %v631_v57  ;;  %v636_v6 = vperm.slane %v630_v60, %v2067_v39 }
 0x125   : > { %v918_v1 = vsel %vm593_vm1, %v917_v58, %v892_v33  ;;  %v912_v7 = vperm.slane %v906_v61, %v2067_v39  ;;  %v624_v10 = vperm.slane %v618_v0, %v2067_v39  ;;  %v640_v11 = vperm.slane %v632_v3, %v2067_v39 }
 0x126   : > { %v924_v4 = vperm.slane %v918_v1, %v2067_v39  ;;  %v935_v5 = vrot.slane %v928_v63, 4  ;;  %v620_v9 = vsel %vm593_vm1, %v612_v38, %v619_v2  ;;  %710 = vrot.lane.b32.xlu0 %v584_v20, %s1860_s19  ;;  %v931_v12 = vrot.slane %v916_v62, 4  ;;  %s1656_s19 = sshll.u32 %s535_s18, 3 }
 0x127   : > { %v628_v15 = vperm.slane %v620_v9, %v2067_v39  ;;  %v645_v17 = vrot.slane %v636_v6, 4  ;;  %v647_v18 = vrot.slane %v640_v11, 4  ;;  %v929_v19 = vrot.slane %v912_v7, 4  ;;  %s537_s15 = scalar_lea.vmem [#allocation4], %s1656_s19  ;;  %s1797_s19 = scalar_lea.hbm %s2417_s16, 16 }
 0x128   : > { %v933_v13 = vrot.slane %v924_v4, 4  ;;  %v936_v14 = vsel %vm593_vm1, 0.0, %v935_v5  ;;  %v641_v21 = vrot.slane %v624_v10, 4  ;;  %v932_v25 = vsel %vm593_vm1, 0.0, %v931_v12  ;;  %s1569_s24 = sshll.u32 %s537_s15, 4  ;;  %s1570_s24 = int_to_ptr.vmem [resolvable:$true] %s1569_s24 }
 0x129   : > { %v953_v16 = vrot.slane %v936_v14, 4  ;;  %v643_v22 = vrot.slane %v628_v15, 4  ;;  %v948_v26 = vsel %vm593_vm1, %v935_v5, %v924_v4  ;;  %v648_v20 = vsel %vm593_vm1, 0.0, %v647_v18 }
 0x12a   : > { %v934_v23 = vsel %vm593_vm1, 0.0, %v933_v13  ;;  %v660_v27 = vsel %vm593_vm1, %v647_v18, %v636_v6  ;;  %v665_v31 = vrot.slane %v648_v20, 4  ;;  %v646_v32 = vsel %vm593_vm1, 0.0, %v645_v17 }
 0x12b   : > { %v644_v28 = vsel %vm593_vm1, 0.0, %v643_v22  ;;  %v649_v29 = vsel %vm593_vm1, %v643_v22, %v624_v10  ;;  %v664_v30 = vperm.slane %v660_v27, %v2057_v24  ;;  %v954_v35 = vsel %vm593_vm1, %v953_v16, %v934_v23 }
 0x12c   : > { %v653_v33 = vperm.slane %v649_v29, %v2057_v24  ;;  %v654_v34 = vrot.slane %v644_v28, 4  ;;  %v642_v36 = vsel %vm593_vm1, 0.0, %v641_v21  ;;  %v666_v37 = vsel %vm593_vm1, %v665_v31, %v646_v32  ;;  %v709_v32 = vpop.permute.xlu1 %708 }
 0x12d   : > { %v685_v38 = vrot.slane %v664_v30, 4  ;;  %v952_v40 = vperm.slane %v948_v26, %v2057_v24  ;;  %v942_v41 = vrot.slane %v932_v25, 4  ;;  %v670_v43 = vperm.slane %v666_v37, %v2057_v24 }
 0x12e   : > { %v655_v42 = vsel %vm593_vm1, %v654_v34, %v642_v36  ;;  %v673_v44 = vrot.slane %v653_v33, 4  ;;  %v930_v45 = vsel %vm593_vm1, 0.0, %v929_v19  ;;  %v937_v46 = vsel %vm593_vm1, %v931_v12, %v912_v7 }
 0x12f   : > { %v659_v47 = vperm.slane %v655_v42, %v2057_v24  ;;  %v958_v48 = vperm.slane %v954_v35, %v2057_v24  ;;  %v683_v49 = vrot.slane %v670_v43, 4  ;;  %v686_v50 = vsel %vm593_vm1, %v670_v43, %v685_v38 }
 0x130   : > { %v694_v53 = vperm.slane %v686_v50, %v2067_v39  ;;  %v973_v54 = vrot.slane %v952_v40, 4  ;;  %v941_v55 = vperm.slane %v937_v46, %v2057_v24  ;;  %v943_v58 = vsel %vm593_vm1, %v942_v41, %v930_v45 }
 0x131   : > { %v671_v51 = vrot.slane %v659_v47, 4  ;;  %v674_v52 = vsel %vm593_vm1, %v659_v47, %v673_v44  ;;  %v684_v57 = vsel %vm593_vm1, %v683_v49, %v664_v30  ;;  %v971_v62 = vrot.slane %v958_v48, 4 }
 0x132   : > { %v682_v56 = vperm.slane %v674_v52, %v2067_v39  ;;  %v690_v60 = vperm.slane %v684_v57, %v2067_v39  ;;  %v699_v61 = vrot.slane %v694_v53, 4  ;;  %v947_v3 = vperm.slane %v943_v58, %v2057_v24 }
 0x133   : > { %v672_v59 = vsel %vm593_vm1, %v671_v51, %v653_v33  ;;  %v974_v4 = vsel %vm593_vm1, %v958_v48, %v973_v54  ;;  %v961_v9 = vrot.slane %v941_v55, 4  ;;  %v972_v10 = vsel %vm593_vm1, %v971_v62, %v952_v40 }
 0x134   : > { %v678_v63 = vperm.slane %v672_v59, %v2067_v39  ;;  %v701_v0 = vrot.slane %v682_v56, 4  ;;  %v695_v1 = vrot.slane %v690_v60, 4  ;;  %v700_v2 = vsel %vm593_vm1, %v699_v61, %v682_v56 }
 0x135   : > { %706 = vst.msk [vmem:[#allocation2 + $0x10] sm:$0xff] %vm703_vm2, %v700_v2  ;;  %v982_v12 = vperm.slane %v974_v4, %v2067_v39  ;;  %v959_v13 = vrot.slane %v947_v3, 4  ;;  %v978_v14 = vperm.slane %v972_v10, %v2067_v39  ;;  %v962_v15 = vsel %vm593_vm1, %v947_v3, %v961_v9 }
 0x136   : > { %v697_v5 = vrot.slane %v678_v63, 4  ;;  %v702_v6 = vsel %vm593_vm1, %v694_v53, %v701_v0  ;;  %v696_v7 = vsel %vm593_vm1, %v695_v1, %v678_v63  ;;  %v970_v19 = vperm.slane %v962_v15, %v2067_v39 }
 0x137   : > { %707 = vst.msk [vmem:[#allocation2 + $0x18] sm:$0xff] %vm703_vm2, %v702_v6  ;;  %v987_v16 = vrot.slane %v982_v12, 4  ;;  %v960_v18 = vsel %vm593_vm1, %v959_v13, %v941_v55  ;;  %v983_v21 = vrot.slane %v978_v14, 4  ;;  %v722_v35 = vrot.slane %v709_v32, 4 }
 0x138   : > { %v698_v11 = vsel %vm593_vm1, %v690_v60, %v697_v5  ;;  %704 = vst.msk [vmem:[#allocation2] sm:$0xff] %vm703_vm2, %v696_v7  ;;  %v966_v26 = vperm.slane %v960_v18, %v2067_v39  ;;  %v989_v30 = vrot.slane %v970_v19, 4 }
 0x139   : > { %705 = vst.msk [vmem:[#allocation2 + $0x8] sm:$0xff] %vm703_vm2, %v698_v11  ;;  %v988_v23 = vsel %vm593_vm1, %v987_v16, %v970_v19 }
 0x13a   : > { %v984_v20 = vsel %vm593_vm1, %v983_v21, %v966_v26  ;;  %v985_v28 = vrot.slane %v966_v26, 4  ;;  %v990_v31 = vsel %vm593_vm1, %v982_v12, %v989_v30 }
 0x13c   : > { %v993_v17 = vld [vmem:[#allocation2 + $0x10] sm:$0xff]  ;;  %v986_v29 = vsel %vm593_vm1, %v978_v14, %v985_v28 }
 0x13d   : > { %1664 = vmatpush.xpose.msk.msrb.mxu0 %vm703_vm2, %v993_v17 }
 0x13e   : > { %v994_v27 = vld [vmem:[#allocation2 + $0x18] sm:$0xff] }
 0x13f   : > { %v991_v22 = vld [vmem:[#allocation2] sm:$0xff] }
 0x140   : > { %1660 = vmatpush.xpose.msk.msra.mxu3 %vm703_vm2, %v991_v22  ;;  %v992_v25 = vld [vmem:[#allocation2 + $0x8] sm:$0xff]  ;;  %1665 = vmatmul.msk.f32.vlgmr.msrb.gmra.mxu0 %vm703_vm2, %v988_v23 }
 0x143   : > { %1661 = vmatmul.msk.f32.vlgmr.msra.gmra.mxu3 %vm703_vm2, %v984_v20 }
 0x144   : > { %1662 = vmatpush.xpose.msk.msrb.mxu3 %vm703_vm2, %v992_v25 }
 0x148   : > { %1666 = vmatpush.xpose.msk.msra.mxu3 %vm703_vm2, %v994_v27 }
 0x14b   : > { %1663 = vmatmul.msk.f32.vlgmr.msrb.gmra.mxu3 %vm703_vm2, %v986_v29 }
 0x153   : > { %1667 = vmatmul.msk.f32.vlgmr.msra.gmra.mxu3 %vm703_vm2, %v990_v31 }
 0x170   : > { %v715_v37 = vpop.permute.xlu2 %714 }
 0x171   : > { %v732_v41 = vrot.slane %v715_v37, 4 }
 0x190   : > { %v713_v33 = vpop.permute.xlu0 %712 }
 0x191   : > { %v720_v34 = vrot.slane %v713_v33, 4  ;;  %v723_v38 = vsel %vm593_vm1, %v713_v33, %v722_v35 }
 0x192   : > { %v731_v42 = vperm.slane %v723_v38, %v2057_v24 }
 0x193   : > { %v721_v36 = vsel %vm593_vm1, %v720_v34, %v709_v32 }
 0x194   : > { %v727_v40 = vperm.slane %v721_v36, %v2057_v24  ;;  %v758_v49 = vrot.slane %v731_v42, 4 }
 0x196   : > { %v746_v46 = vrot.slane %v727_v40, 4 }
 0x198   : > { %v711_v43 = vpop.permute.xlu0 %710 }
 0x199   : > { %v733_v44 = vsel %vm593_vm1, %v732_v41, %v711_v43  ;;  %v734_v45 = vrot.slane %v711_v43, 4 }
 0x19a   : > { %v739_v47 = vperm.slane %v733_v44, %v2057_v24 }
 0x19b   : > { %v735_v48 = vsel %vm593_vm1, %v715_v37, %v734_v45 }
 0x19c   : > { %v743_v50 = vperm.slane %v735_v48, %v2057_v24  ;;  %v744_v51 = vrot.slane %v739_v47, 4  ;;  %v747_v52 = vsel %vm593_vm1, %v739_v47, %v746_v46 }
 0x19d   : > { %v755_v53 = vperm.slane %v747_v52, %v2067_v39 }
 0x19e   : > { %v745_v54 = vsel %vm593_vm1, %v744_v51, %v727_v40  ;;  %v756_v55 = vrot.slane %v743_v50, 4  ;;  %v759_v56 = vsel %vm593_vm1, %v743_v50, %v758_v49 }
 0x19f   : > { %v751_v57 = vperm.slane %v745_v54, %v2067_v39  ;;  %v767_v58 = vperm.slane %v759_v56, %v2067_v39  ;;  %v770_v59 = vrot.slane %v755_v53, 4 }
 0x1a0   : > { %v757_v60 = vsel %vm593_vm1, %v756_v55, %v731_v42  ;;  %v1743_v42 = vld [vmem:[%s544_s23] ss:$0 sm:$0xff]  ;;  %s1864_s23 = smov 16  }
 0x1a1   : > { %v763_v61 = vperm.slane %v757_v60, %v2067_v39  ;;  %v768_v62 = vrot.slane %v751_v57, 4  ;;  %v771_v63 = vsel %vm593_vm1, 0.0, %v770_v59  ;;  %v774_v0 = vrot.slane %v767_v58, 4 }
 0x1a2   : > { %v776_v1 = vsel %vm593_vm1, %v770_v59, %v751_v57  ;;  %v781_v2 = vrot.slane %v771_v63, 4 }
 0x1a3   : > { %v769_v3 = vsel %vm593_vm1, 0.0, %v768_v62  ;;  %v772_v4 = vrot.slane %v763_v61, 4  ;;  %v775_v5 = vsel %vm593_vm1, 0.0, %v774_v0  ;;  %v780_v6 = vperm.slane %v776_v1, %v2057_v24 }
 0x1a4   : > { %v782_v7 = vsel %vm593_vm1, %v781_v2, %v769_v3  ;;  %v787_v9 = vsel %vm593_vm1, %v774_v0, %v763_v61  ;;  %v792_v10 = vrot.slane %v775_v5, 4 }
 0x1a5   : > { %v773_v11 = vsel %vm593_vm1, 0.0, %v772_v4  ;;  %v786_v12 = vperm.slane %v782_v7, %v2057_v24  ;;  %v791_v13 = vperm.slane %v787_v9, %v2057_v24  ;;  %v800_v14 = vrot.slane %v780_v6, 4 }
 0x1a6   : > { %v793_v15 = vsel %vm593_vm1, %v792_v10, %v773_v11 }
 0x1a7   : > { %v797_v16 = vperm.slane %v793_v15, %v2057_v24  ;;  %v798_v17 = vrot.slane %v786_v12, 4  ;;  %v801_v18 = vsel %vm593_vm1, %v786_v12, %v800_v14  ;;  %v812_v19 = vrot.slane %v791_v13, 4 }
 0x1a8   : > { %v809_v21 = vperm.slane %v801_v18, %v2067_v39 }
 0x1a9   : > { %v799_v22 = vsel %vm593_vm1, %v798_v17, %v780_v6  ;;  %v810_v23 = vrot.slane %v797_v16, 4  ;;  %v813_v25 = vsel %vm593_vm1, %v797_v16, %v812_v19 }
 0x1aa   : > { %v805_v26 = vperm.slane %v799_v22, %v2067_v39  ;;  %v821_v20 = vperm.slane %v813_v25, %v2067_v39  ;;  %v828_v27 = vrot.slane %v809_v21, 4 }
 0x1ab   : > { %v811_v28 = vsel %vm593_vm1, %v810_v23, %v791_v13 }
 0x1ac   : > { %v817_v29 = vperm.slane %v811_v28, %v2067_v39  ;;  %v824_v30 = vrot.slane %v805_v26, 4  ;;  %v826_v31 = vrot.slane %v821_v20, 4  ;;  %v829_v32 = vsel %vm593_vm1, %v821_v20, %v828_v27 }
 0x1ad   : > { %833 = vst.msk [vmem:[#allocation3 + $0x18] sm:$0xff] %vm703_vm2, %v829_v32 }
 0x1ae   : > { %v822_v33 = vrot.slane %v817_v29, 4  ;;  %v825_v34 = vsel %vm593_vm1, %v817_v29, %v824_v30  ;;  %v827_v35 = vsel %vm593_vm1, %v826_v31, %v809_v21 }
 0x1af   : > { %831 = vst.msk [vmem:[#allocation3 + $0x8] sm:$0xff] %vm703_vm2, %v825_v34 }
 0x1b0   : > { %v823_v36 = vsel %vm593_vm1, %v822_v33, %v805_v26  ;;  %832 = vst.msk [vmem:[#allocation3 + $0x10] sm:$0xff] %vm703_vm2, %v827_v35 }
 0x1b1   : > { %830 = vst.msk [vmem:[#allocation3] sm:$0xff] %vm703_vm2, %v823_v36 }
 0x1b4   : > { %v998_v37 = vld [vmem:[#allocation3 + $0x18] sm:$0xff] }
 0x1b5   : > { %1230 = vmatpush.msrb.mxu3 %v998_v37 }
 0x1b6   : > { %v996_v38 = vld [vmem:[#allocation3 + $0x8] sm:$0xff] }
 0x1b7   : > { %1184 = vmatpush.msrb.mxu1 %v996_v38  ;;  %v997_v40 = vld [vmem:[#allocation3 + $0x10] sm:$0xff] }
 0x1b8   : > { %v995_v41 = vld [vmem:[#allocation3] sm:$0xff] }
 0x1b9   : > { %1207 = vmatpush.msra.mxu1 %v997_v40  ;;  %1161 = vmatpush.msra.mxu0 %v995_v41 }
 0x1bd   : > { %v1078_v43 = vpop.f32.mrf.mxu0 }
 0x1be   : > { %v1079_v44 = vadd.f32 %v1743_v42, %v1078_v43 }
 0x1c0   : > { %v1113_v45 = vsel %vm703_vm2, %v1079_v44, -inf }
 0x1c1   : > { %1114 = vmax.xlane.f32.xlu0 %v1113_v45 }
 0x1c6   : > { %v1026_v46 = vpop.f32.mrf.mxu3 }
 0x1c7   : > { %v1027_v53 = vadd.f32 %v1743_v42, %v1026_v46 }
 0x1c9   : > { %v1107_v54 = vsel %vm703_vm2, %v1027_v53, -inf }
 0x1ce   : > { %v1052_v47 = vpop.f32.mrf.mxu3 }
 0x1cf   : > { %v1053_v48 = vadd.f32 %v1743_v42, %v1052_v47 }
 0x1d1   : > { %v1110_v49 = vsel %vm703_vm2, %v1053_v48, -inf }
 0x1d2   : > { %1111 = vmax.xlane.f32.xlu1 %v1110_v49 }
 0x1d6   : > { %v1104_v50 = vpop.f32.mrf.mxu3 }
 0x1d7   : > { %v1105_v51 = vadd.f32 %v1743_v42, %v1104_v50 }
 0x1d9   : > { %v1116_v52 = vsel %vm703_vm2, %v1105_v51, -inf }
 0x1da   : > { %1117 = vmax.xlane.f32.xlu2 %v1116_v52 }
 0x1e2   : > { %1108 = vmax.xlane.f32.xlu2 %v1107_v54 }
 0x234   : > { %v1115_v55 = vpop.xlane.xlu0 %1114 }
 0x235   : > { %v1121_v56 = vsub.f32 %v1079_v44, %v1115_v55 }
 0x237   : > { %v1127_v57 = vmul.f32 1.442695, %v1121_v56 }
 0x239   : > { %1753 = vpow2.f32 %v1127_v57 }
 0x23f   : > { %v1754_v58 = vpop.eup %1753 }
 0x240   : > { %v1137_v59 = vsel %vm703_vm2, %v1754_v58, 0.0 }
 0x241   : > { %1138 = vadd.xlane.f32.xlu1 %v1137_v59 }
 0x245   : > { %v1112_v60 = vpop.xlane.xlu1 %1111 }
 0x246   : > { %v1120_v61 = vsub.f32 %v1053_v48, %v1112_v60 }
 0x248   : > { %v1125_v62 = vmul.f32 1.442695, %v1120_v61 }
 0x24a   : > { %1755 = vpow2.f32 %v1125_v62 }
 0x24d   : > { %v1118_v63 = vpop.xlane.xlu2 %1117 }
 0x24e   : > { %v1122_v0 = vsub.f32 %v1105_v51, %v1118_v63 }
 0x250   : > { %v1756_v1 = vpop.eup %1755  ;;  %v1129_v2 = vmul.f32 1.442695, %v1122_v0 }
 0x251   : > { %1669 = vmatmul.msk.f32.vlgmr.msrb.gmra.mxu1 %vm703_vm2, %v1756_v1  ;;  %v1134_v3 = vsel %vm703_vm2, %v1756_v1, 0.0 }
 0x252   : > { %1757 = vpow2.f32 %v1129_v2  ;;  %1135 = vadd.xlane.f32.xlu1 %v1134_v3 }
 0x255   : > { %v1109_v4 = vpop.xlane.xlu2 %1108 }
 0x256   : > { %v1119_v5 = vsub.f32 %v1027_v53, %v1109_v4 }
 0x258   : > { %v1758_v6 = vpop.eup %1757  ;;  %v1123_v7 = vmul.f32 1.442695, %v1119_v5 }
 0x259   : > { %1670 = vmatmul.msk.f32.vlgmr.msra.gmra.mxu1 %vm703_vm2, %v1754_v58  ;;  %1671 = vmatmul.msk.f32.vlgmr.msrb.gmra.mxu3 %vm703_vm2, %v1758_v6  ;;  %v1140_v9 = vsel %vm703_vm2, %v1758_v6, 0.0 }
 0x25a   : > { %1759 = vpow2.f32 %v1123_v7  ;;  %1141 = vadd.xlane.f32.xlu0 %v1140_v9 }
 0x260   : > { %v1760_v10 = vpop.eup %1759 }
 0x261   : > { %1668 = vmatmul.msk.f32.vlgmr.msra.gmra.mxu0 %vm703_vm2, %v1760_v10  ;;  %v1131_v11 = vsel %vm703_vm2, %v1760_v10, 0.0 }
 0x262   : > { %1132 = vadd.xlane.f32.xlu2 %v1131_v11 }
 0x2b4   : > { %v1139_v12 = vpop.xlane.xlu1 %1138 }
 0x2c5   : > { %v1136_v14 = vpop.xlane.xlu1 %1135 }
 0x2c6   : > { %1761 = vrcp.f32 %v1136_v14 }
 0x2c7   : > { %1763 = vrcp.f32 %v1139_v12 }
 0x2cc   : > { %v1762_v17 = vpop.eup %1761 }
 0x2cd   : > { %v1142_v15 = vpop.xlane.xlu0 %1141  ;;  %v1764_v21 = vpop.eup %1763 }
 0x2ce   : > { %v1186_v13 = vpop.f32.mrf.mxu1  ;;  %1765 = vrcp.f32 %v1142_v15 }
 0x2cf   : > { %v1240_v19 = vmul.f32 %v1762_v17, %v1186_v13 }
 0x2d1   : > { %v1257_v26 = vrot.slane %v1240_v19, 4 }
 0x2d4   : > { %v1766_v23 = vpop.eup %1765 }
 0x2d5   : > { %v1133_v16 = vpop.xlane.xlu2 %1132 }
 0x2d6   : > { %1767 = vrcp.f32 %v1133_v16  ;;  %v1209_v18 = vpop.f32.mrf.mxu1 }
 0x2d7   : > { %v1241_v22 = vmul.f32 %v1764_v21, %v1209_v18 }
 0x2d9   : > { %v1243_v29 = vrot.slane %v1241_v22, 4 }
 0x2dc   : > { %v1232_v25 = vpop.f32.mrf.mxu3  ;;  %v1768_v27 = vpop.eup %1767 }
 0x2dd   : > { %v1242_v20 = vmul.f32 %v1766_v23, %v1232_v25 }
 0x2de   : > { %v1163_v28 = vpop.f32.mrf.mxu0 }
 0x2df   : > { %v1255_v30 = vrot.slane %v1242_v20, 4  ;;  %v1258_v31 = vsel %vm593_vm1, %v1242_v20, %v1257_v26  ;;  %v1239_v32 = vmul.f32 %v1768_v27, %v1163_v28 }
 0x2e0   : > { %v1266_v33 = vperm.slane %v1258_v31, %v2057_v24  ;;  %v1370_v31 = vld [vmem:[%s2407_s6] sm:$0xff] }
 0x2e1   : > { %v1256_v34 = vsel %vm593_vm1, %v1255_v30, %v1240_v19  ;;  %v1244_v35 = vsel %vm593_vm1, %v1243_v29, %v1239_v32  ;;  %v1245_v36 = vrot.slane %v1239_v32, 4  ;;  %v1373_v29 = vld [vmem:[%s2407_s6 + $0x18] sm:$0xff]  ;;  %v1371_v30 = vld [vmem:[%s2407_s6 + $0x8] sm:$0xff] }
 0x2e2   : > { %v1262_v37 = vperm.slane %v1256_v34, %v2057_v24  ;;  %v1250_v38 = vperm.slane %v1244_v35, %v2057_v24  ;;  %v1279_v42 = vrot.slane %v1266_v33, 4  ;;  %1393 = vmatpush.msrb.mxu0 %v1373_v29 }
 0x2e3   : > { %v1246_v40 = vsel %vm593_vm1, %v1241_v22, %v1245_v36 }
 0x2e4   : > { %v1267_v41 = vrot.slane %v1262_v37, 4  ;;  %v1254_v43 = vperm.slane %v1246_v40, %v2057_v24  ;;  %v1269_v44 = vrot.slane %v1250_v38, 4 }
 0x2e6   : > { %v1268_v45 = vsel %vm593_vm1, %v1267_v41, %v1250_v38  ;;  %v1270_v46 = vsel %vm593_vm1, %v1262_v37, %v1269_v44  ;;  %v1280_v47 = vsel %vm593_vm1, %v1279_v42, %v1254_v43  ;;  %v1281_v48 = vrot.slane %v1254_v43, 4  ;;  %v1746_v38 = vld [vmem:[%s2408_s7] ss:$0 sm:$0xff] }
 0x2e7   : > { %v1274_v49 = vperm.slane %v1268_v45, %v2067_v39  ;;  %v1278_v50 = vperm.slane %v1270_v46, %v2067_v39  ;;  %v1286_v51 = vperm.slane %v1280_v47, %v2067_v39  ;;  %v1866_v44 = vmov 32.0  }
 0x2e8   : > { %v1282_v52 = vsel %vm593_vm1, %v1266_v33, %v1281_v48  ;;  %1769 = vrcp.f32 %v1866_v44 }
 0x2e9   : > { %v1290_v53 = vperm.slane %v1282_v52, %v2067_v39  ;;  %v1291_v54 = vrot.slane %v1274_v49, 4  ;;  %v1293_v55 = vrot.slane %v1278_v50, 4  ;;  %v1295_v57 = vrot.slane %v1286_v51, 4 }
 0x2eb   : > { %v1294_v56 = vsel %vm593_vm1, 0.0, %v1293_v55  ;;  %v1297_v58 = vrot.slane %v1290_v53, 4  ;;  %v1299_v59 = vsel %vm593_vm1, %v1293_v55, %v1274_v49  ;;  %v1292_v62 = vsel %vm593_vm1, 0.0, %v1291_v54  ;;  %v1444_v55 = vld [vmem:[%s2411_s10 + $0x18] sm:$0xff] }
 0x2ec   : > { %v1304_v60 = vrot.slane %v1294_v56, 4  ;;  %v1303_v61 = vperm.slane %v1299_v59, %v2057_v24  ;;  %v1296_v5 = vsel %vm593_vm1, 0.0, %v1295_v57  ;;  %1464 = vmatpush.msrb.mxu1 %v1444_v55  ;;  %v1443_v56 = vld [vmem:[%s2411_s10 + $0x10] sm:$0xff]  ;;  %v1442_v57 = vld [vmem:[%s2411_s10 + $0x8] sm:$0xff]  ;;  %v1496_v59 = vld [vmem:[%s2413_s12 + $0x78] sm:$0xff] }
 0x2ed   : > { %v1298_v63 = vsel %vm593_vm1, 0.0, %v1297_v58  ;;  %v1310_v0 = vsel %vm593_vm1, %v1297_v58, %v1286_v51  ;;  %v1441_v58 = vld [vmem:[%s2411_s10] sm:$0xff]  ;;  %1501 = vmatpush.msra.mxu2 %v1496_v59 }
 0x2ee   : > { %v1305_v1 = vsel %vm593_vm1, %v1304_v60, %v1292_v62  ;;  %v1314_v2 = vperm.slane %v1310_v0, %v2057_v24  ;;  %v1315_v3 = vrot.slane %v1298_v63, 4  ;;  %v1323_v4 = vrot.slane %v1303_v61, 4  ;;  %v1770_v45 = vpop.eup %1769  ;;  %1465 = vmatpush.msrb.mxu1 %v1443_v56  ;;  %v1495_v60 = vld [vmem:[%s2413_s12 + $0x70] sm:$0xff]  ;;  %v1493_v0 = vld [vmem:[%s2413_s12 + $0x60] sm:$0xff] }
 0x2ef   : > { %v1309_v6 = vperm.slane %v1305_v1, %v2057_v24  ;;  %v1408_v46 = vmul.f32 32.0, %v1770_v45  ;;  %vm1412_vm5 = vweird.f32 %v1770_v45  ;;  %1502 = vmatpush.msra.mxu2 %v1495_v60  ;;  %v1752_v60 = vld [vmem:[%s2437_s17] ss:$0 sm:$0xff] }
 0x2f0   : > { %v1316_v7 = vsel %vm593_vm1, %v1315_v3, %v1296_v5  ;;  %v1335_v9 = vrot.slane %v1314_v2, 4  ;;  %1466 = vmatpush.msrb.mxu1 %v1442_v57 }
 0x2f1   : > { %v1320_v10 = vperm.slane %v1316_v7, %v2057_v24  ;;  %v1324_v11 = vsel %vm593_vm1, %v1309_v6, %v1323_v4  ;;  %v1321_v12 = vrot.slane %v1309_v6, 4  ;;  %v1409_v47 = vsub.f32 1.0, %v1408_v46 }
 0x2f2   : > { %v1332_v13 = vperm.slane %v1324_v11, %v2067_v39  ;;  %1467 = vmatpush.msrb.mxu1 %v1441_v58  ;;  %v1751_v58 = vld [vmem:[%s2415_s14] ss:$0 sm:$0xff] }
 0x2f3   : > { %v1336_v14 = vsel %vm593_vm1, %v1320_v10, %v1335_v9  ;;  %v1322_v15 = vsel %vm593_vm1, %v1321_v12, %v1303_v61  ;;  %v1333_v16 = vrot.slane %v1320_v10, 4  ;;  %v1410_v48 = vmul.f32 %v1770_v45, %v1409_v47  ;;  %v1494_v61 = vld [vmem:[%s2413_s12 + $0x68] sm:$0xff]  ;;  %v1747_v9 = vld [vmem:[%s2409_s8] ss:$0 sm:$0xff] }
 0x2f4   : > { %v1344_v17 = vperm.slane %v1336_v14, %v2067_v39  ;;  %v1351_v18 = vrot.slane %v1332_v13, 4  ;;  %v1328_v19 = vperm.slane %v1322_v15, %v2067_v39  ;;  %1503 = vmatpush.msra.mxu2 %v1494_v61  ;;  %v1748_v12 = vld [vmem:[%s2410_s9] ss:$0 sm:$0xff]  ;;  %v1492_v15 = vld [vmem:[%s2413_s12 + $0x58] sm:$0xff] }
 0x2f5   : > { %v1334_v21 = vsel %vm593_vm1, %v1333_v16, %v1314_v2  ;;  %v1411_v49 = vadd.f32 %v1770_v45, %v1410_v48  ;;  %v1491_v16 = vld [vmem:[%s2413_s12 + $0x50] sm:$0xff] }
 0x2f6   : > { %v1352_v22 = vsel %vm593_vm1, %v1344_v17, %v1351_v18  ;;  %v1349_v24 = vrot.slane %v1344_v17, 4  ;;  %v1340_v23 = vperm.slane %v1334_v21, %v2067_v39  ;;  %v1347_v25 = vrot.slane %v1328_v19, 4  ;;  %v1372_v39 = vld [vmem:[%s2407_s6 + $0x10] sm:$0xff]  ;;  %1504 = vmatpush.msra.mxu2 %v1493_v0  ;;  %v1490_v17 = vld [vmem:[%s2413_s12 + $0x48] sm:$0xff]  ;;  %v1489_v18 = vld [vmem:[%s2413_s12 + $0x40] sm:$0xff] }
 0x2f7   : > { %1362 = vrot.lane.b32.xlu1 %v1352_v22, %s1863_s21  ;;  %1394 = vmatpush.msrb.mxu0 %v1372_v39  ;;  %v2275_v50 = vsel %vm1412_vm5, %v1770_v45, %v1411_v49  ;;  %v1487_v21 = vld [vmem:[%s2413_s12 + $0x30] sm:$0xff]  ;;  %v1486_v22 = vld [vmem:[%s2413_s12 + $0x28] sm:$0xff]  ;;  %s1791_s21 = sshra.s32 %s1572_s26, 4  ;;  %s1792_s21 = int_to_ptr.hbm [resolvable:$true] %s1791_s21 }
 0x2f8   : > { %v1350_v26 = vsel %vm593_vm1, %v1349_v24, %v1332_v13  ;;  %v1345_v20 = vrot.slane %v1340_v23, 4  ;;  %v1348_v27 = vsel %vm593_vm1, %v1340_v23, %v1347_v25  ;;  %1505 = vmatpush.msra.mxu2 %v1492_v15  ;;  %v1485_v24 = vld [vmem:[%s2413_s12 + $0x20] sm:$0xff]  ;;  %v1484_v23 = vld [vmem:[%s2413_s12 + $0x18] sm:$0xff]  ;;  %v1483_v25 = vld [vmem:[%s2413_s12 + $0x10] sm:$0xff]  ;;  %s1793_s30 = scalar_lea.hbm %s1792_s21, 8  ;;  %p1798_p1 = scmp.lt.s32.totalorder %s1792_s21, %s2417_s16 }
 0x2f9   : > { %1358 = vrot.lane.b32.xlu0 %v1350_v26, %s1864_s23  ;;  %1354 = vrot.lane.b32.xlu2 %v1348_v27, %s1865_s27  ;;  %v1482_v26 = vld [vmem:[%s2413_s12 + $0x8] sm:$0xff]  ;;  %v1749_v27 = vld [vmem:[%s2412_s11] ss:$0 sm:$0xff]  ;;  %p1794_p12 = scmp.ne.s32.totalorder %s1792_s21, %s1793_s30  ;;  %p1799_p2 = scmp.lt.s32.totalorder %s1797_s19, %s1793_s30 }
 0x2fa   : > { %v1346_v28 = vsel %vm593_vm1, %v1345_v20, %v1328_v19  ;;  %1395 = vmatpush.msrb.mxu0 %v1371_v30  ;;  %1506 = vmatpush.msra.mxu2 %v1491_v16  ;;  %v1488_v19 = vld [vmem:[%s2413_s12 + $0x38] sm:$0xff]  ;;  %v1481_v20 = vld [vmem:[%s2413_s12] sm:$0xff] }
 0x2fb   : > { %p1795_p13 = pnand %p1794_p12, %p1992_p4  ;;  %p1800_p3 = por %p1799_p2, %p1798_p1 }
 0x2fc   : > { %1396 = vmatpush.msrb.mxu0 %v1370_v31  ;;  %1507 = vmatpush.msra.mxu2 %v1490_v17 }
 0x2fd   : > { %p1796_p0 = pneg %p1795_p13 }
 0x2fe   : > { %1508 = vmatpush.msra.mxu2 %v1489_v18 }
 0x2ff   : > { %p1801_p5 = pnand %p1800_p3, %p1796_p0 }
 0x300   : > { %1509 = vmatpush.msra.mxu2 %v1488_v19 }
 0x302   : > { %1510 = vmatpush.msra.mxu2 %v1487_v21 }
 0x304   : > { %1511 = vmatpush.msra.mxu2 %v1486_v22 }
 0x306   : > { %1512 = vmatpush.msra.mxu2 %v1485_v24 }
 0x308   : > { %1513 = vmatpush.msra.mxu2 %v1484_v23 }
 0x30a   : > { %1514 = vmatpush.msra.mxu2 %v1483_v25 }
 0x30c   : > { %1515 = vmatpush.msra.mxu2 %v1482_v26 }
 0x30e   : > { %1516 = vmatpush.msra.mxu2 %v1481_v20 }
 0x353   : > { %v1355_v32 = vpop.permute.xlu2 %1354 }
 0x354   : > { %v1365_v33 = vsel %vm703_vm2, %v1346_v28, %v1355_v32 }
 0x369   : > { %v1363_v35 = vpop.permute.xlu1 %1362 }
 0x36b   : > { %v1359_v34 = vpop.permute.xlu0 %1358 }
 0x36c   : > { %v1367_v36 = vsel %vm1366_vm3, %v1365_v33, %v1359_v34 }
 0x36d   : > { %v1369_v37 = vsel %vm1368_vm4, %v1367_v36, %v1363_v35 }
 0x36e   : > { %1672 = vmatmul.msk.f32.vlgmr.msrb.gmra.mxu0 %vm558_vm0, %v1369_v37 }
 0x3eb   : > { %v1398_v40 = vpop.f32.mrf.mxu0 }
 0x3ec   : > { %v1399_v41 = vadd.f32 %v1746_v38, %v1398_v40  ;;  %v1750_v38 = vld [vmem:[%s2414_s13] ss:$0 sm:$0xff] }
 0x3ee   : > { %v1401_v42 = vadd.f32 %v1399_v41, %v2043_v8 }
 0x3f0   : > { %v1404_v43 = vsel %vm558_vm0, %v1401_v42, 0.0 }
 0x3f1   : > { %1405 = vadd.xlane.f32.xlu0 %v1404_v43 }
 0x464   : > { %v1406_v51 = vpop.xlane.xlu0 %1405 }
 0x465   : > { %v1414_v52 = vmul.f32 %v2275_v50, %v1406_v51 }
 0x467   : > { %v1415_v53 = vsub.f32 %v1401_v42, %v1414_v52 }
 0x469   : > { %v1416_v54 = vmul.f32 %v1415_v53, %v1415_v53 }
 0x46b   : > { %v1417_v8 = vsel %vm558_vm0, %v1416_v54, 0.0 }
 0x46c   : > { %1418 = vadd.xlane.f32.xlu2 %v1417_v8 }
 0x4df   : > { %v1419_v62 = vpop.xlane.xlu2 %1418 }
 0x4e0   : > { %v1420_v63 = vmul.f32 %v1419_v62, %v2275_v50 }
 0x4e2   : > { %v1421_v1 = vadd.f32 1e-12, %v1420_v63 }
 0x4e4   : > { %1771 = vrsqrt.f32 %v1421_v1  ;;  %vm1428_vm7 = vweird.f32 %v1421_v1 }
 0x4ea   : > { %v1772_v2 = vpop.eup %1771 }
 0x4eb   : > { %v1423_v3 = vmul.f32 %v1772_v2, %v1421_v1  ;;  %vm1429_vm6 = vweird.f32 %v1772_v2 }
 0x4ec   : > { %vm1430_vm8 = vmor %vm1428_vm7, %vm1429_vm6 }
 0x4ed   : > { %v1424_v4 = vmul.f32 %v1772_v2, %v1423_v3 }
 0x4ef   : > { %v1425_v5 = vmul.f32 0.5, %v1424_v4 }
 0x4f1   : > { %v1426_v6 = vsub.f32 1.5, %v1425_v5 }
 0x4f3   : > { %v1427_v7 = vmul.f32 %v1772_v2, %v1426_v6 }
 0x4f5   : > { %v1431_v10 = vsel %vm1430_vm8, %v1772_v2, %v1427_v7 }
 0x4f6   : > { %v1432_v11 = vmul.f32 %v1431_v10, %v1415_v53 }
 0x4f8   : > { %v1436_v13 = vmul.f32 %v1747_v9, %v1432_v11 }
 0x4fa   : > { %v1440_v14 = vadd.f32 %v1748_v12, %v1436_v13 }
 0x4fc   : > { %1673 = vmatmul.msk.f32.vlgmr.msrb.gmra.mxu1 %vm558_vm0, %v1440_v14 }
 0x579   : > { %v1469_v28 = vpop.f32.mrf.mxu1 }
 0x57a   : > { %v1470_v29 = vadd.f32 %v1749_v27, %v1469_v28 }
 0x57c   : > { %v1473_v39 = vmul.f32 %v1470_v29, %v1470_v29  ;;  %v1472_v35 = vmul.f32 0.5, %v1470_v29 }
 0x57e   : > { %v1474_v30 = vmul.f32 %v1473_v39, %v1470_v29 }
 0x580   : > { %v1475_v31 = vmul.f32 0.044715, %v1474_v30 }
 0x582   : > { %v1476_v32 = vadd.f32 %v1475_v31, %v1470_v29 }
 0x584   : > { %v1477_v33 = vmul.f32 0.7978846, %v1476_v32 }
 0x586   : > { %1773 = vtanh.f32 %v1477_v33 }
 0x58c   : > { %v1774_v34 = vpop.eup %1773 }
 0x58d   : > { %v1479_v36 = vadd.f32 1.0, %v1774_v34 }
 0x58f   : > { %v1480_v37 = vmul.f32 %v1479_v36, %v1472_v35 }
 0x591   : > { %1517 = vmatmul.f32.vlgmr.msra.gmra.mxu2 %v1480_v37 }
 0x614   : > { %v1518_v40 = vpop.f32.mrf.mxu2 }
 0x615   : > { %v1519_v41 = vadd.f32 %v1750_v38, %v1518_v40 }
 0x617   : > { %v1521_v42 = vadd.f32 %v1519_v41, %v1440_v14 }
 0x619   : > { %v1524_v43 = vsel %vm558_vm0, %v1521_v42, 0.0 }
 0x61a   : > { %1525 = vadd.xlane.f32.xlu1 %v1524_v43 }
 0x68d   : > { %v1526_v44 = vpop.xlane.xlu1 %1525 }
 0x68e   : > { %v1527_v45 = vmul.f32 %v1526_v44, %v2275_v50 }
 0x690   : > { %v1528_v46 = vsub.f32 %v1521_v42, %v1527_v45 }
 0x692   : > { %v1529_v47 = vmul.f32 %v1528_v46, %v1528_v46 }
 0x694   : > { %v1530_v48 = vsel %vm558_vm0, %v1529_v47, 0.0 }
 0x695   : > { %1531 = vadd.xlane.f32.xlu0 %v1530_v48 }
 0x708   : > { %v1532_v49 = vpop.xlane.xlu0 %1531 }
 0x709   : > { %v1533_v51 = vmul.f32 %v1532_v49, %v2275_v50 }
 0x70b   : > { %v1534_v52 = vadd.f32 1e-12, %v1533_v51 }
 0x70d   : > { %1775 = vrsqrt.f32 %v1534_v52  ;;  %vm1541_vm10 = vweird.f32 %v1534_v52 }
 0x713   : > { %v1776_v53 = vpop.eup %1775 }
 0x714   : > { %v1536_v54 = vmul.f32 %v1776_v53, %v1534_v52  ;;  %vm1542_vm9 = vweird.f32 %v1776_v53 }
 0x715   : > { %vm1543_vm11 = vmor %vm1541_vm10, %vm1542_vm9 }
 0x716   : > { %v1537_v8 = vmul.f32 %v1776_v53, %v1536_v54 }
 0x718   : > { %v1538_v55 = vmul.f32 0.5, %v1537_v8 }
 0x71a   : > { %v1539_v56 = vsub.f32 1.5, %v1538_v55 }
 0x71c   : > { %v1540_v57 = vmul.f32 %v1776_v53, %v1539_v56 }
 0x71e   : > { %v1544_v50 = vsel %vm1543_vm11, %v1776_v53, %v1540_v57 }
 0x71f   : > { %v1545_v59 = vmul.f32 %v1544_v50, %v1528_v46 }
 0x721   : > { %v1549_v61 = vmul.f32 %v1751_v58, %v1545_v59 }
 0x723   : > { %v1553_v62 = vadd.f32 %v1752_v60, %v1549_v61 }
 0x725   : > { %1554 = vst.msk [vmem:[%s537_s15] sm:$0xff] %vm558_vm0, %v1553_v62 }
 0x726   : > { %1804 = shalt.err (!%p1801_p5)
}
 0x727   : > { %1678 = dma.vmem_to_hbm [thread:$0]  (%p1992_p4), %s1570_s24, 128, %s1572_s26, %s1556_s20  }
 0x728 PF: > { %s2438_s18 = sld [smem:[#allocation10_spill]] }
 0x729   : > { %s2439_s25 = sld [smem:[#allocation7_spill]] }
 0x72e   : > { %p1684_p6 = scmp.ge.s32.totalorder %s2438_s18, 2 }
 0x72f   : > { %s1583_s15 = sand.u32 1, %s2439_s25  }
 0x730   : > { %p1681_p7 = pnand %p1684_p6, %p1999_p8  ;;  %s1584_s23 = scalar_lea.sflag [#allocation5], %s1583_s15 }
 0x732   : > { %p1682_p9 = pneg %p1681_p7 }
 0x734   : > { %1830 = dma.done.wait (%p1682_p9), %s1584_s23, 128  }
 0x735   : > { %1832 = vsyncadd (%p1682_p9), %s1584_s23, 4294967168  ;;  %s29_s26 = sadd.s32 1, %s2438_s18   ;;  %s2441_s30 = sld [smem:[#allocation8_spill]] }
 0x736   : > { %p26_p10 = scmp.ge.s32.totalorder %s29_s26, 4   ;;  %s2442_s23 = sld [smem:[#allocation13_spill]] }
 0x737   : > { %s2443_s24 = sld [smem:[#allocation9_spill]]  ;;  %s2445_s21 = smov %s1839_s22 }
 0x738   : > { %s2444_s25 = sld [smem:[#allocation11_spill]]  ;;  %28 = sbr.rel (!%p26_p10) target bundleno = 7 (0x7), region = 127 }
 0x73b   : > { %s2446_s22 = smov %s2441_s30 }
 0x73d   :  { %1590 = vsyncpa [#allocation5], 1 }
 0x73e   :  { %1592 = vsyncpa [#allocation5 + $0x1], 1 }

</bundles_post_ra>
